<compile_context>
chip_gen: v5e
topology: v5e:2x2
jax: 0.10.0
libtpu: 0.0.40
codegen_flags: <defaults>
</compile_context>

<pallas_src>
import functools

import jax
import jax.numpy as jnp
from jax.experimental import pallas as pl
from jax.experimental.pallas import tpu as pltpu

BN_EPS = 1e-5


def _pick_tho(ho, w_in, wo):
    """Smallest divisor of Ho whose input/output lane blocks are 128-aligned.

    Falls back to THO = Ho (blocks equal the full array dims, always legal)."""
    for t in range(1, ho + 1):
        if ho % t:
            continue
        if (2 * t * w_in) % 128 == 0 and (t * wo) % 128 == 0:
            return t
    return ho


def _conv_stats_kernel(x_ref, w_ref, sel_ref, y_ref, stats_ref, *,
                       cout, tho, width, wo):
    """Pass 1: conv tile (MXU) -> lane-dense pre-BN output + per-tile stats.

    x_ref    : (1, Cin, 2*THO*width)  channels on sublanes, flat spatial on lanes
    w_ref    : (4, Cout, Cin)         per-tap weight matrices, g = kh*2 + kw
    sel_ref  : (2*width, 4*wo)        0/1 tap-permutation matrix
    y_ref    : (1, Cout, THO*wo)      pre-BN conv output (lane-dense)
    stats_ref: (1, 1, Cout, 2)        [sum, sum_sq] over the tile's spatial dims
    """
    xx = x_ref[0]                      # (Cin, 2*THO*width)
    sel = sel_ref[...]                 # (2*width, 4*wo)
    s1 = jnp.zeros((cout, 1), jnp.float32)
    s2 = jnp.zeros((cout, 1), jnp.float32)
    for tl in range(tho):
        # Input rows 2*tl and 2*tl+1 of this tile, all channels at once.
        rows = xx[:, 2 * tl * width:(2 * tl + 2) * width]          # (Cin, 2*width)
        # One permutation dot extracts all four 2x2 taps for every channel.
        p = jnp.dot(rows, sel, preferred_element_type=jnp.float32)  # (Cin, 4*wo)
        # Channel contraction on the MXU, one dot per tap, f32 accumulation.
        y_tl = jnp.dot(w_ref[0], p[:, 0:wo],
                       preferred_element_type=jnp.float32)           # (Cout, wo)
        for g in range(1, 4):
            y_tl = y_tl + jnp.dot(w_ref[g], p[:, g * wo:(g + 1) * wo],
                                  preferred_element_type=jnp.float32)
        # Assemble the lane-dense output tile (HBM writeback is one dense block).
        y_ref[0, :, tl * wo:(tl + 1) * wo] = y_tl.astype(y_ref.dtype)
        s1 = s1 + jnp.sum(y_tl, axis=1, keepdims=True)
        s2 = s2 + jnp.sum(y_tl * y_tl, axis=1, keepdims=True)
    stats_ref[0, 0, :, 0:1] = s1
    stats_ref[0, 0, :, 1:2] = s2


def _bn_relu_kernel(y_ref, scale_ref, shift_ref, o_ref):
    """Pass 2: y * scale + shift, ReLU (all lane-dense, pure elementwise)."""
    y = y_ref[0]                                    # (Cout, THO*Wo)
    o_ref[0] = jnp.maximum(y * scale_ref[...] + shift_ref[...],
                           0.0).astype(o_ref.dtype)


@jax.jit
def convolution_downsample(x_nchw, conv_weight, bn_gamma, bn_beta):
    """x_nchw: (N, Cin, H, W); conv_weight: (Cout, Cin, 2, 2) PyTorch OIHW;
    bn_gamma / bn_beta: (Cout,).  Returns (N, Cout, H//2, W//2) float32."""
    N, Cin, H, W = x_nchw.shape
    Cout = conv_weight.shape[0]
    if H % 2 or W % 2:
        raise ValueError("2x2 stride-2 conv needs even spatial dims")
    Ho, Wo = H // 2, W // 2
    THO = _pick_tho(Ho, W, Wo)
    n_t = Ho // THO
    M_tile = THO * Wo
    M_total = N * Ho * Wo

    # Free metadata reshape: channels stay major, all spatial flattens to lanes.
    x_flat = x_nchw.reshape(N, Cin, H * W).astype(jnp.float32)

    # Per-tap weight matrices, g = kh*2 + kw.
    w_taps = jnp.stack([conv_weight[:, :, 0, 0], conv_weight[:, :, 0, 1],
                        conv_weight[:, :, 1, 0], conv_weight[:, :, 1, 1]],
                       axis=0).astype(jnp.float32)                  # (4, Cout, Cin)

    # Tap-permutation matrix: sel[kh*W + 2*wo + kw, g*Wo + wo] = 1.
    kh = jnp.array([0, 0, 1, 1], dtype=jnp.int32)
    kw = jnp.array([0, 1, 0, 1], dtype=jnp.int32)
    wo_idx = jnp.arange(Wo, dtype=jnp.int32)
    target = (kh[:, None] * W + 2 * wo_idx[None, :] + kw[:, None]).reshape(4 * Wo)
    sel = (jnp.arange(2 * W, dtype=jnp.int32)[:, None] ==
           target[None, :]).astype(jnp.float32)                     # (2W, 4*Wo)

    # BlockSpecs (all minor block dims are 128-multiples or full extents).
    x_spec = pl.BlockSpec((1, Cin, 2 * THO * W), lambda n, t: (n, 0, t))
    w_spec = pl.BlockSpec((4, Cout, Cin), lambda n, t: (0, 0, 0))
    sel_spec = pl.BlockSpec((2 * W, 4 * Wo), lambda n, t: (0, 0))
    y_spec = pl.BlockSpec((1, Cout, M_tile), lambda n, t: (n, 0, t))
    st_spec = pl.BlockSpec((1, 1, Cout, 2), lambda n, t: (n, t, 0, 0))
    vec_spec = pl.BlockSpec((Cout, 1), lambda n, t: (0, 0))
    cparams = pltpu.CompilerParams(dimension_semantics=("parallel", "parallel"))

    x_bytes = N * Cin * H * W * 4
    y_bytes = N * Cout * Ho * Wo * 4
    conv_flops = 2 * M_total * Cout * Cin * 4
    sel_flops = 2 * N * Ho * Cin * (2 * W) * (4 * Wo)
    const_bytes = w_taps.size * 4 + sel.size * 4

    # ---------------- pass 1: conv (MXU) + partial BN statistics ------------
    y_pre, stats = pl.pallas_call(
        functools.partial(_conv_stats_kernel, cout=Cout, tho=THO, width=W, wo=Wo),
        out_shape=(jax.ShapeDtypeStruct((N, Cout, Ho * Wo), jnp.float32),
                   jax.ShapeDtypeStruct((N, n_t, Cout, 2), jnp.float32)),
        grid=(N, n_t),
        in_specs=[x_spec, w_spec, sel_spec],
        out_specs=(y_spec, st_spec),
        compiler_params=cparams,
        cost_estimate=pl.CostEstimate(
            flops=conv_flops + sel_flops + 4 * M_total * Cout,
            transcendentals=0,
            bytes_accessed=x_bytes + y_bytes + N * n_t * Cout * 8 + const_bytes),
    )(x_flat, w_taps, sel)

    # Tiny combine of partials -> folded per-channel scale / shift.
    tot = jnp.sum(stats, axis=(0, 1))                 # (Cout, 2)
    mean = tot[:, 0] / M_total
    var = tot[:, 1] / M_total - mean * mean           # biased (training-mode BN)
    inv_std = jax.lax.rsqrt(var + BN_EPS)
    scale_v = bn_gamma.astype(jnp.float32) * inv_std
    shift_v = bn_beta.astype(jnp.float32) - mean * scale_v
    scale2 = scale_v.reshape(Cout, 1)
    shift2 = shift_v.reshape(Cout, 1)

    # ---------------- pass 2: elementwise BN(scale,shift) + ReLU ------------
    out_flat = pl.pallas_call(
        _bn_relu_kernel,
        out_shape=jax.ShapeDtypeStruct((N, Cout, Ho * Wo), jnp.float32),
        grid=(N, n_t),
        in_specs=[y_spec, vec_spec, vec_spec],
        out_specs=y_spec,
        compiler_params=cparams,
        cost_estimate=pl.CostEstimate(
            flops=3 * M_total * Cout,
            transcendentals=0,
            bytes_accessed=2 * y_bytes + Cout * 8),
    )(y_pre, scale2, shift2)

    # Free metadata reshape back to NCHW (contiguous array).
    return out_flat.reshape(N, Cout, Ho, Wo)


def _reference(x_nchw, conv_weight, bn_gamma, bn_beta):
    y = jax.lax.conv_general_dilated(
        x_nchw.astype(jnp.float32),
        conv_weight.astype(jnp.float32),
        window_strides=(2, 2),
        padding="VALID",
        dimension_numbers=("NCHW", "OIHW", "NCHW"),
    )
    mean = jnp.mean(y, axis=(0, 2, 3), keepdims=True)
    var = jnp.var(y, axis=(0, 2, 3), keepdims=True)   # biased, as training BN uses
    y_hat = (y - mean) * jax.lax.rsqrt(var + BN_EPS)
    out = y_hat * bn_gamma.reshape(1, -1, 1, 1) + bn_beta.reshape(1, -1, 1, 1)
    return jnp.maximum(out, 0.0)


if __name__ == "__main__":
    key = jax.random.PRNGKey(0)
    k_x, k_w, k_g, k_b = jax.random.split(key, 4)

    N, Cin, H, W = 2, 4, 16, 16
    Cout = 8

    x = jax.random.normal(k_x, (N, Cin, H, W), dtype=jnp.float32)
    conv_w = jax.random.normal(k_w, (Cout, Cin, 2, 2), dtype=jnp.float32) * 0.2
    gamma = 1.0 + 0.1 * jax.random.normal(k_g, (Cout,), dtype=jnp.float32)
    beta = 0.1 * jax.random.normal(k_b, (Cout,), dtype=jnp.float32)

    out = convolution_downsample(x, conv_w, gamma, beta)
    out = jax.block_until_ready(out)

    ref = _reference(x, conv_w, gamma, beta)
    assert out.shape == (N, Cout, H // 2, W // 2), out.shape
    max_err = float(jnp.max(jnp.abs(out - ref)))
    assert jnp.allclose(out, ref, atol=1e-4, rtol=1e-4), max_err
    print("KERNEL_OK")
</pallas_src>

<mosaic_0001>
module attributes {stable_mosaic.version = 11 : i64} {
  func.func @_bn_relu_kernel(%arg0: i32, %arg1: i32, %arg2: memref<1x8x64xf32, #tpu.memory_space<vmem>>, %arg3: memref<8x1xf32, #tpu.memory_space<vmem>>, %arg4: memref<8x1xf32, #tpu.memory_space<vmem>>, %arg5: memref<1x8x64xf32, #tpu.memory_space<vmem>>) attributes {dimension_semantics = [#tpu.dimension_semantics<parallel>, #tpu.dimension_semantics<parallel>], iteration_bounds = array<i64: 2, 1>, scalar_prefetch = 0 : i64, scratch_operands = 0 : i64, tpu.core_type = #tpu.core_type<tc>, window_params = [{transform_indices = @transform_0, window_bounds = array<i64: 1, 8, 64>}, {pipeline_mode = #tpu.pipeline_mode<synchronous>, transform_indices = @transform_1, window_bounds = array<i64: 8, 1>}, {pipeline_mode = #tpu.pipeline_mode<synchronous>, transform_indices = @transform_2, window_bounds = array<i64: 8, 1>}, {transform_indices = @transform_3, window_bounds = array<i64: 1, 8, 64>}]} {
    %c0 = arith.constant 0 : index
    %c0_0 = arith.constant 0 : index
    %c0_1 = arith.constant 0 : index
    %0 = vector.load %arg2[%c0, %c0_0, %c0_1] : memref<1x8x64xf32, #tpu.memory_space<vmem>>, vector<1x8x64xf32>
    %1 = vector.shape_cast %0 : vector<1x8x64xf32> to vector<8x64xf32>
    %c0_2 = arith.constant 0 : index
    %c0_3 = arith.constant 0 : index
    %2 = vector.load %arg3[%c0_2, %c0_3] : memref<8x1xf32, #tpu.memory_space<vmem>>, vector<8x1xf32>
    %3 = vector.broadcast %2 : vector<8x1xf32> to vector<8x64xf32>
    %4 = arith.mulf %1, %3 : vector<8x64xf32>
    %c0_4 = arith.constant 0 : index
    %c0_5 = arith.constant 0 : index
    %5 = vector.load %arg4[%c0_4, %c0_5] : memref<8x1xf32, #tpu.memory_space<vmem>>, vector<8x1xf32>
    %6 = vector.broadcast %5 : vector<8x1xf32> to vector<8x64xf32>
    %7 = arith.addf %4, %6 : vector<8x64xf32>
    %cst = arith.constant 0.000000e+00 : f32
    %8 = vector.broadcast %cst : f32 to vector<8x64xf32>
    %9 = arith.maximumf %7, %8 : vector<8x64xf32>
    %c0_6 = arith.constant 0 : index
    %c0_7 = arith.constant 0 : index
    %c0_8 = arith.constant 0 : index
    %10 = vector.load %arg5[%c0_6, %c0_7, %c0_8] : memref<1x8x64xf32, #tpu.memory_space<vmem>>, vector<1x8x64xf32>
    %11 = vector.shape_cast %10 : vector<1x8x64xf32> to vector<8x64xf32>
    %12 = vector.shape_cast %9 : vector<8x64xf32> to vector<1x8x64xf32>
    tpu.vector_store %arg5[%c0_6, %c0_7, %c0_8], %12 {strides = array<i32>} : memref<1x8x64xf32, #tpu.memory_space<vmem>>, vector<1x8x64xf32>,
    return
  }
  func.func @transform_0(%arg0: i32, %arg1: i32) -> (i32, i32, i32) {
    %c0_i32 = arith.constant 0 : i32
    %c0_i32_0 = arith.constant 0 : i32
    return %arg0, %c0_i32, %arg1 : i32, i32, i32
  }
  func.func @transform_1(%arg0: i32, %arg1: i32) -> (i32, i32) {
    %c0_i32 = arith.constant 0 : i32
    %c0_i32_0 = arith.constant 0 : i32
    %c0_i32_1 = arith.constant 0 : i32
    return %c0_i32, %c0_i32_0 : i32, i32
  }
  func.func @transform_2(%arg0: i32, %arg1: i32) -> (i32, i32) {
    %c0_i32 = arith.constant 0 : i32
    %c0_i32_0 = arith.constant 0 : i32
    %c0_i32_1 = arith.constant 0 : i32
    return %c0_i32, %c0_i32_0 : i32, i32
  }
  func.func @transform_3(%arg0: i32, %arg1: i32) -> (i32, i32, i32) {
    %c0_i32 = arith.constant 0 : i32
    %c0_i32_0 = arith.constant 0 : i32
    return %arg0, %c0_i32, %arg1 : i32, i32, i32
  }
}

module attributes {stable_mosaic.version = 11 : i64} {
  func.func @_conv_stats_kernel(%arg0: i32, %arg1: i32, %arg2: memref<1x4x256xf32, #tpu.memory_space<vmem>>, %arg3: memref<4x8x4xf32, #tpu.memory_space<vmem>>, %arg4: memref<32x32xf32, #tpu.memory_space<vmem>>, %arg5: memref<1x8x64xf32, #tpu.memory_space<vmem>>, %arg6: memref<1x1x8x2xf32, #tpu.memory_space<vmem>>) attributes {dimension_semantics = [#tpu.dimension_semantics<parallel>, #tpu.dimension_semantics<parallel>], iteration_bounds = array<i64: 2, 1>, scalar_prefetch = 0 : i64, scratch_operands = 0 : i64, tpu.core_type = #tpu.core_type<tc>, window_params = [{transform_indices = @transform_0, window_bounds = array<i64: 1, 4, 256>}, {pipeline_mode = #tpu.pipeline_mode<synchronous>, transform_indices = @transform_1, window_bounds = array<i64: 4, 8, 4>}, {pipeline_mode = #tpu.pipeline_mode<synchronous>, transform_indices = @transform_2, window_bounds = array<i64: 32, 32>}, {transform_indices = @transform_3, window_bounds = array<i64: 1, 8, 64>}, {transform_indices = @transform_4, window_bounds = array<i64: 1, 1, 8, 2>}]} {
    %c0 = arith.constant 0 : index
    %c0_0 = arith.constant 0 : index
    %c0_1 = arith.constant 0 : index
    %0 = vector.load %arg2[%c0, %c0_0, %c0_1] : memref<1x4x256xf32, #tpu.memory_space<vmem>>, vector<1x4x256xf32>
    %1 = vector.shape_cast %0 : vector<1x4x256xf32> to vector<4x256xf32>
    %c0_2 = arith.constant 0 : index
    %c0_3 = arith.constant 0 : index
    %2 = vector.load %arg4[%c0_2, %c0_3] : memref<32x32xf32, #tpu.memory_space<vmem>>, vector<32x32xf32>
    %cst = arith.constant 0.000000e+00 : f32
    %3 = vector.broadcast %cst : f32 to vector<8x1xf32>
    %cst_4 = arith.constant 0.000000e+00 : f32
    %4 = vector.broadcast %cst_4 : f32 to vector<8x1xf32>
    %5 = vector.extract_strided_slice %1 {offsets = [0, 0], sizes = [4, 32], strides = [1, 1]} : vector<4x256xf32> to vector<4x32xf32>
    %cst_5 = arith.constant dense<0.000000e+00> : vector<4x32xf32>
    %6 = tpu.matmul %5, %2, %cst_5 {dimension_numbers = #tpu.dot_dimension_numbers<[1], [0], [0], [1], [0, 0, 1, 1], [], []>} : vector<4x32xf32>, vector<32x32xf32>, vector<4x32xf32> -> vector<4x32xf32>
    %c0_6 = arith.constant 0 : index
    %c0_7 = arith.constant 0 : index
    %c0_8 = arith.constant 0 : index
    %7 = vector.load %arg3[%c0_6, %c0_7, %c0_8] : memref<4x8x4xf32, #tpu.memory_space<vmem>>, vector<1x8x4xf32>
    %8 = vector.shape_cast %7 : vector<1x8x4xf32> to vector<8x4xf32>
    %9 = vector.extract_strided_slice %6 {offsets = [0, 0], sizes = [4, 8], strides = [1, 1]} : vector<4x32xf32> to vector<4x8xf32>
    %cst_9 = arith.constant dense<0.000000e+00> : vector<8x8xf32>
    %10 = tpu.matmul %8, %9, %cst_9 {dimension_numbers = #tpu.dot_dimension_numbers<[1], [0], [0], [1], [0, 0, 1, 1], [], []>} : vector<8x4xf32>, vector<4x8xf32>, vector<8x8xf32> -> vector<8x8xf32>
    %c1 = arith.constant 1 : index
    %c0_10 = arith.constant 0 : index
    %c0_11 = arith.constant 0 : index
    %11 = vector.load %arg3[%c1, %c0_10, %c0_11] : memref<4x8x4xf32, #tpu.memory_space<vmem>>, vector<1x8x4xf32>
    %12 = vector.shape_cast %11 : vector<1x8x4xf32> to vector<8x4xf32>
    %13 = vector.extract_strided_slice %6 {offsets = [0, 8], sizes = [4, 8], strides = [1, 1]} : vector<4x32xf32> to vector<4x8xf32>
    %cst_12 = arith.constant dense<0.000000e+00> : vector<8x8xf32>
    %14 = tpu.matmul %12, %13, %cst_12 {dimension_numbers = #tpu.dot_dimension_numbers<[1], [0], [0], [1], [0, 0, 1, 1], [], []>} : vector<8x4xf32>, vector<4x8xf32>, vector<8x8xf32> -> vector<8x8xf32>
    %15 = arith.addf %10, %14 : vector<8x8xf32>
    %c2 = arith.constant 2 : index
    %c0_13 = arith.constant 0 : index
    %c0_14 = arith.constant 0 : index
    %16 = vector.load %arg3[%c2, %c0_13, %c0_14] : memref<4x8x4xf32, #tpu.memory_space<vmem>>, vector<1x8x4xf32>
    %17 = vector.shape_cast %16 : vector<1x8x4xf32> to vector<8x4xf32>
    %18 = vector.extract_strided_slice %6 {offsets = [0, 16], sizes = [4, 8], strides = [1, 1]} : vector<4x32xf32> to vector<4x8xf32>
    %cst_15 = arith.constant dense<0.000000e+00> : vector<8x8xf32>
    %19 = tpu.matmul %17, %18, %cst_15 {dimension_numbers = #tpu.dot_dimension_numbers<[1], [0], [0], [1], [0, 0, 1, 1], [], []>} : vector<8x4xf32>, vector<4x8xf32>, vector<8x8xf32> -> vector<8x8xf32>
    %20 = arith.addf %15, %19 : vector<8x8xf32>
    %c3 = arith.constant 3 : index
    %c0_16 = arith.constant 0 : index
    %c0_17 = arith.constant 0 : index
    %21 = vector.load %arg3[%c3, %c0_16, %c0_17] : memref<4x8x4xf32, #tpu.memory_space<vmem>>, vector<1x8x4xf32>
    %22 = vector.shape_cast %21 : vector<1x8x4xf32> to vector<8x4xf32>
    %23 = vector.extract_strided_slice %6 {offsets = [0, 24], sizes = [4, 8], strides = [1, 1]} : vector<4x32xf32> to vector<4x8xf32>
    %cst_18 = arith.constant dense<0.000000e+00> : vector<8x8xf32>
    %24 = tpu.matmul %22, %23, %cst_18 {dimension_numbers = #tpu.dot_dimension_numbers<[1], [0], [0], [1], [0, 0, 1, 1], [], []>} : vector<8x4xf32>, vector<4x8xf32>, vector<8x8xf32> -> vector<8x8xf32>
    %25 = arith.addf %20, %24 : vector<8x8xf32>
    %c0_19 = arith.constant 0 : index
    %c0_20 = arith.constant 0 : index
    %c0_21 = arith.constant 0 : index
    %26 = vector.load %arg5[%c0_19, %c0_20, %c0_21] : memref<1x8x64xf32, #tpu.memory_space<vmem>>, vector<1x8x8xf32>
    %27 = vector.shape_cast %26 : vector<1x8x8xf32> to vector<8x8xf32>
    %28 = vector.shape_cast %25 : vector<8x8xf32> to vector<1x8x8xf32>
    tpu.vector_store %arg5[%c0_19, %c0_20, %c0_21], %28 {strides = array<i32>} : memref<1x8x64xf32, #tpu.memory_space<vmem>>, vector<1x8x8xf32>,
    %cst_22 = arith.constant dense<0.000000e+00> : vector<8xf32>
    %29 = vector.multi_reduction <add>, %25, %cst_22 [1] : vector<8x8xf32> to vector<8xf32>
    %30 = vector.shape_cast %29 : vector<8xf32> to vector<8x1xf32>
    %31 = arith.addf %3, %30 : vector<8x1xf32>
    %32 = arith.mulf %25, %25 : vector<8x8xf32>
    %cst_23 = arith.constant dense<0.000000e+00> : vector<8xf32>
    %33 = vector.multi_reduction <add>, %32, %cst_23 [1] : vector<8x8xf32> to vector<8xf32>
    %34 = vector.shape_cast %33 : vector<8xf32> to vector<8x1xf32>
    %35 = arith.addf %4, %34 : vector<8x1xf32>
    %36 = vector.extract_strided_slice %1 {offsets = [0, 32], sizes = [4, 32], strides = [1, 1]} : vector<4x256xf32> to vector<4x32xf32>
    %cst_24 = arith.constant dense<0.000000e+00> : vector<4x32xf32>
    %37 = tpu.matmul %36, %2, %cst_24 {dimension_numbers = #tpu.dot_dimension_numbers<[1], [0], [0], [1], [0, 0, 1, 1], [], []>} : vector<4x32xf32>, vector<32x32xf32>, vector<4x32xf32> -> vector<4x32xf32>
    %c0_25 = arith.constant 0 : index
    %c0_26 = arith.constant 0 : index
    %c0_27 = arith.constant 0 : index
    %38 = vector.load %arg3[%c0_25, %c0_26, %c0_27] : memref<4x8x4xf32, #tpu.memory_space<vmem>>, vector<1x8x4xf32>
    %39 = vector.shape_cast %38 : vector<1x8x4xf32> to vector<8x4xf32>
    %40 = vector.extract_strided_slice %37 {offsets = [0, 0], sizes = [4, 8], strides = [1, 1]} : vector<4x32xf32> to vector<4x8xf32>
    %cst_28 = arith.constant dense<0.000000e+00> : vector<8x8xf32>
    %41 = tpu.matmul %39, %40, %cst_28 {dimension_numbers = #tpu.dot_dimension_numbers<[1], [0], [0], [1], [0, 0, 1, 1], [], []>} : vector<8x4xf32>, vector<4x8xf32>, vector<8x8xf32> -> vector<8x8xf32>
    %c1_29 = arith.constant 1 : index
    %c0_30 = arith.constant 0 : index
    %c0_31 = arith.constant 0 : index
    %42 = vector.load %arg3[%c1_29, %c0_30, %c0_31] : memref<4x8x4xf32, #tpu.memory_space<vmem>>, vector<1x8x4xf32>
    %43 = vector.shape_cast %42 : vector<1x8x4xf32> to vector<8x4xf32>
    %44 = vector.extract_strided_slice %37 {offsets = [0, 8], sizes = [4, 8], strides = [1, 1]} : vector<4x32xf32> to vector<4x8xf32>
    %cst_32 = arith.constant dense<0.000000e+00> : vector<8x8xf32>
    %45 = tpu.matmul %43, %44, %cst_32 {dimension_numbers = #tpu.dot_dimension_numbers<[1], [0], [0], [1], [0, 0, 1, 1], [], []>} : vector<8x4xf32>, vector<4x8xf32>, vector<8x8xf32> -> vector<8x8xf32>
    %46 = arith.addf %41, %45 : vector<8x8xf32>
    %c2_33 = arith.constant 2 : index
    %c0_34 = arith.constant 0 : index
    %c0_35 = arith.constant 0 : index
    %47 = vector.load %arg3[%c2_33, %c0_34, %c0_35] : memref<4x8x4xf32, #tpu.memory_space<vmem>>, vector<1x8x4xf32>
    %48 = vector.shape_cast %47 : vector<1x8x4xf32> to vector<8x4xf32>
    %49 = vector.extract_strided_slice %37 {offsets = [0, 16], sizes = [4, 8], strides = [1, 1]} : vector<4x32xf32> to vector<4x8xf32>
    %cst_36 = arith.constant dense<0.000000e+00> : vector<8x8xf32>
    %50 = tpu.matmul %48, %49, %cst_36 {dimension_numbers = #tpu.dot_dimension_numbers<[1], [0], [0], [1], [0, 0, 1, 1], [], []>} : vector<8x4xf32>, vector<4x8xf32>, vector<8x8xf32> -> vector<8x8xf32>
    %51 = arith.addf %46, %50 : vector<8x8xf32>
    %c3_37 = arith.constant 3 : index
    %c0_38 = arith.constant 0 : index
    %c0_39 = arith.constant 0 : index
    %52 = vector.load %arg3[%c3_37, %c0_38, %c0_39] : memref<4x8x4xf32, #tpu.memory_space<vmem>>, vector<1x8x4xf32>
    %53 = vector.shape_cast %52 : vector<1x8x4xf32> to vector<8x4xf32>
    %54 = vector.extract_strided_slice %37 {offsets = [0, 24], sizes = [4, 8], strides = [1, 1]} : vector<4x32xf32> to vector<4x8xf32>
    %cst_40 = arith.constant dense<0.000000e+00> : vector<8x8xf32>
    %55 = tpu.matmul %53, %54, %cst_40 {dimension_numbers = #tpu.dot_dimension_numbers<[1], [0], [0], [1], [0, 0, 1, 1], [], []>} : vector<8x4xf32>, vector<4x8xf32>, vector<8x8xf32> -> vector<8x8xf32>
    %56 = arith.addf %51, %55 : vector<8x8xf32>
    %c0_41 = arith.constant 0 : index
    %c0_42 = arith.constant 0 : index
    %c8 = arith.constant 8 : index
    %57 = vector.load %arg5[%c0_41, %c0_42, %c8] : memref<1x8x64xf32, #tpu.memory_space<vmem>>, vector<1x8x8xf32>
    %58 = vector.shape_cast %57 : vector<1x8x8xf32> to vector<8x8xf32>
    %59 = vector.shape_cast %56 : vector<8x8xf32> to vector<1x8x8xf32>
    tpu.vector_store %arg5[%c0_41, %c0_42, %c8], %59 {strides = array<i32>} : memref<1x8x64xf32, #tpu.memory_space<vmem>>, vector<1x8x8xf32>,
    %cst_43 = arith.constant dense<0.000000e+00> : vector<8xf32>
    %60 = vector.multi_reduction <add>, %56, %cst_43 [1] : vector<8x8xf32> to vector<8xf32>
    %61 = vector.shape_cast %60 : vector<8xf32> to vector<8x1xf32>
    %62 = arith.addf %31, %61 : vector<8x1xf32>
    %63 = arith.mulf %56, %56 : vector<8x8xf32>
    %cst_44 = arith.constant dense<0.000000e+00> : vector<8xf32>
    %64 = vector.multi_reduction <add>, %63, %cst_44 [1] : vector<8x8xf32> to vector<8xf32>
    %65 = vector.shape_cast %64 : vector<8xf32> to vector<8x1xf32>
    %66 = arith.addf %35, %65 : vector<8x1xf32>
    %67 = vector.extract_strided_slice %1 {offsets = [0, 64], sizes = [4, 32], strides = [1, 1]} : vector<4x256xf32> to vector<4x32xf32>
    %cst_45 = arith.constant dense<0.000000e+00> : vector<4x32xf32>
    %68 = tpu.matmul %67, %2, %cst_45 {dimension_numbers = #tpu.dot_dimension_numbers<[1], [0], [0], [1], [0, 0, 1, 1], [], []>} : vector<4x32xf32>, vector<32x32xf32>, vector<4x32xf32> -> vector<4x32xf32>
    %c0_46 = arith.constant 0 : index
    %c0_47 = arith.constant 0 : index
    %c0_48 = arith.constant 0 : index
    %69 = vector.load %arg3[%c0_46, %c0_47, %c0_48] : memref<4x8x4xf32, #tpu.memory_space<vmem>>, vector<1x8x4xf32>
    %70 = vector.shape_cast %69 : vector<1x8x4xf32> to vector<8x4xf32>
    %71 = vector.extract_strided_slice %68 {offsets = [0, 0], sizes = [4, 8], strides = [1, 1]} : vector<4x32xf32> to vector<4x8xf32>
    %cst_49 = arith.constant dense<0.000000e+00> : vector<8x8xf32>
    %72 = tpu.matmul %70, %71, %cst_49 {dimension_numbers = #tpu.dot_dimension_numbers<[1], [0], [0], [1], [0, 0, 1, 1], [], []>} : vector<8x4xf32>, vector<4x8xf32>, vector<8x8xf32> -> vector<8x8xf32>
    %c1_50 = arith.constant 1 : index
    %c0_51 = arith.constant 0 : index
    %c0_52 = arith.constant 0 : index
    %73 = vector.load %arg3[%c1_50, %c0_51, %c0_52] : memref<4x8x4xf32, #tpu.memory_space<vmem>>, vector<1x8x4xf32>
    %74 = vector.shape_cast %73 : vector<1x8x4xf32> to vector<8x4xf32>
    %75 = vector.extract_strided_slice %68 {offsets = [0, 8], sizes = [4, 8], strides = [1, 1]} : vector<4x32xf32> to vector<4x8xf32>
    %cst_53 = arith.constant dense<0.000000e+00> : vector<8x8xf32>
    %76 = tpu.matmul %74, %75, %cst_53 {dimension_numbers = #tpu.dot_dimension_numbers<[1], [0], [0], [1], [0, 0, 1, 1], [], []>} : vector<8x4xf32>, vector<4x8xf32>, vector<8x8xf32> -> vector<8x8xf32>
    %77 = arith.addf %72, %76 : vector<8x8xf32>
    %c2_54 = arith.constant 2 : index
    %c0_55 = arith.constant 0 : index
    %c0_56 = arith.constant 0 : index
    %78 = vector.load %arg3[%c2_54, %c0_55, %c0_56] : memref<4x8x4xf32, #tpu.memory_space<vmem>>, vector<1x8x4xf32>
    %79 = vector.shape_cast %78 : vector<1x8x4xf32> to vector<8x4xf32>
    %80 = vector.extract_strided_slice %68 {offsets = [0, 16], sizes = [4, 8], strides = [1, 1]} : vector<4x32xf32> to vector<4x8xf32>
    %cst_57 = arith.constant dense<0.000000e+00> : vector<8x8xf32>
    %81 = tpu.matmul %79, %80, %cst_57 {dimension_numbers = #tpu.dot_dimension_numbers<[1], [0], [0], [1], [0, 0, 1, 1], [], []>} : vector<8x4xf32>, vector<4x8xf32>, vector<8x8xf32> -> vector<8x8xf32>
    %82 = arith.addf %77, %81 : vector<8x8xf32>
    %c3_58 = arith.constant 3 : index
    %c0_59 = arith.constant 0 : index
    %c0_60 = arith.constant 0 : index
    %83 = vector.load %arg3[%c3_58, %c0_59, %c0_60] : memref<4x8x4xf32, #tpu.memory_space<vmem>>, vector<1x8x4xf32>
    %84 = vector.shape_cast %83 : vector<1x8x4xf32> to vector<8x4xf32>
    %85 = vector.extract_strided_slice %68 {offsets = [0, 24], sizes = [4, 8], strides = [1, 1]} : vector<4x32xf32> to vector<4x8xf32>
    %cst_61 = arith.constant dense<0.000000e+00> : vector<8x8xf32>
    %86 = tpu.matmul %84, %85, %cst_61 {dimension_numbers = #tpu.dot_dimension_numbers<[1], [0], [0], [1], [0, 0, 1, 1], [], []>} : vector<8x4xf32>, vector<4x8xf32>, vector<8x8xf32> -> vector<8x8xf32>
    %87 = arith.addf %82, %86 : vector<8x8xf32>
    %c0_62 = arith.constant 0 : index
    %c0_63 = arith.constant 0 : index
    %c16 = arith.constant 16 : index
    %88 = vector.load %arg5[%c0_62, %c0_63, %c16] : memref<1x8x64xf32, #tpu.memory_space<vmem>>, vector<1x8x8xf32>
    %89 = vector.shape_cast %88 : vector<1x8x8xf32> to vector<8x8xf32>
    %90 = vector.shape_cast %87 : vector<8x8xf32> to vector<1x8x8xf32>
    tpu.vector_store %arg5[%c0_62, %c0_63, %c16], %90 {strides = array<i32>} : memref<1x8x64xf32, #tpu.memory_space<vmem>>, vector<1x8x8xf32>,
    %cst_64 = arith.constant dense<0.000000e+00> : vector<8xf32>
    %91 = vector.multi_reduction <add>, %87, %cst_64 [1] : vector<8x8xf32> to vector<8xf32>
    %92 = vector.shape_cast %91 : vector<8xf32> to vector<8x1xf32>
    %93 = arith.addf %62, %92 : vector<8x1xf32>
    %94 = arith.mulf %87, %87 : vector<8x8xf32>
    %cst_65 = arith.constant dense<0.000000e+00> : vector<8xf32>
    %95 = vector.multi_reduction <add>, %94, %cst_65 [1] : vector<8x8xf32> to vector<8xf32>
    %96 = vector.shape_cast %95 : vector<8xf32> to vector<8x1xf32>
    %97 = arith.addf %66, %96 : vector<8x1xf32>
    %98 = vector.extract_strided_slice %1 {offsets = [0, 96], sizes = [4, 32], strides = [1, 1]} : vector<4x256xf32> to vector<4x32xf32>
    %cst_66 = arith.constant dense<0.000000e+00> : vector<4x32xf32>
    %99 = tpu.matmul %98, %2, %cst_66 {dimension_numbers = #tpu.dot_dimension_numbers<[1], [0], [0], [1], [0, 0, 1, 1], [], []>} : vector<4x32xf32>, vector<32x32xf32>, vector<4x32xf32> -> vector<4x32xf32>
    %c0_67 = arith.constant 0 : index
    %c0_68 = arith.constant 0 : index
    %c0_69 = arith.constant 0 : index
    %100 = vector.load %arg3[%c0_67, %c0_68, %c0_69] : memref<4x8x4xf32, #tpu.memory_space<vmem>>, vector<1x8x4xf32>
    %101 = vector.shape_cast %100 : vector<1x8x4xf32> to vector<8x4xf32>
    %102 = vector.extract_strided_slice %99 {offsets = [0, 0], sizes = [4, 8], strides = [1, 1]} : vector<4x32xf32> to vector<4x8xf32>
    %cst_70 = arith.constant dense<0.000000e+00> : vector<8x8xf32>
    %103 = tpu.matmul %101, %102, %cst_70 {dimension_numbers = #tpu.dot_dimension_numbers<[1], [0], [0], [1], [0, 0, 1, 1], [], []>} : vector<8x4xf32>, vector<4x8xf32>, vector<8x8xf32> -> vector<8x8xf32>
    %c1_71 = arith.constant 1 : index
    %c0_72 = arith.constant 0 : index
    %c0_73 = arith.constant 0 : index
    %104 = vector.load %arg3[%c1_71, %c0_72, %c0_73] : memref<4x8x4xf32, #tpu.memory_space<vmem>>, vector<1x8x4xf32>
    %105 = vector.shape_cast %104 : vector<1x8x4xf32> to vector<8x4xf32>
    %106 = vector.extract_strided_slice %99 {offsets = [0, 8], sizes = [4, 8], strides = [1, 1]} : vector<4x32xf32> to vector<4x8xf32>
    %cst_74 = arith.constant dense<0.000000e+00> : vector<8x8xf32>
    %107 = tpu.matmul %105, %106, %cst_74 {dimension_numbers = #tpu.dot_dimension_numbers<[1], [0], [0], [1], [0, 0, 1, 1], [], []>} : vector<8x4xf32>, vector<4x8xf32>, vector<8x8xf32> -> vector<8x8xf32>
    %108 = arith.addf %103, %107 : vector<8x8xf32>
    %c2_75 = arith.constant 2 : index
    %c0_76 = arith.constant 0 : index
    %c0_77 = arith.constant 0 : index
    %109 = vector.load %arg3[%c2_75, %c0_76, %c0_77] : memref<4x8x4xf32, #tpu.memory_space<vmem>>, vector<1x8x4xf32>
    %110 = vector.shape_cast %109 : vector<1x8x4xf32> to vector<8x4xf32>
    %111 = vector.extract_strided_slice %99 {offsets = [0, 16], sizes = [4, 8], strides = [1, 1]} : vector<4x32xf32> to vector<4x8xf32>
    %cst_78 = arith.constant dense<0.000000e+00> : vector<8x8xf32>
    %112 = tpu.matmul %110, %111, %cst_78 {dimension_numbers = #tpu.dot_dimension_numbers<[1], [0], [0], [1], [0, 0, 1, 1], [], []>} : vector<8x4xf32>, vector<4x8xf32>, vector<8x8xf32> -> vector<8x8xf32>
    %113 = arith.addf %108, %112 : vector<8x8xf32>
    %c3_79 = arith.constant 3 : index
    %c0_80 = arith.constant 0 : index
    %c0_81 = arith.constant 0 : index
    %114 = vector.load %arg3[%c3_79, %c0_80, %c0_81] : memref<4x8x4xf32, #tpu.memory_space<vmem>>, vector<1x8x4xf32>
    %115 = vector.shape_cast %114 : vector<1x8x4xf32> to vector<8x4xf32>
    %116 = vector.extract_strided_slice %99 {offsets = [0, 24], sizes = [4, 8], strides = [1, 1]} : vector<4x32xf32> to vector<4x8xf32>
    %cst_82 = arith.constant dense<0.000000e+00> : vector<8x8xf32>
    %117 = tpu.matmul %115, %116, %cst_82 {dimension_numbers = #tpu.dot_dimension_numbers<[1], [0], [0], [1], [0, 0, 1, 1], [], []>} : vector<8x4xf32>, vector<4x8xf32>, vector<8x8xf32> -> vector<8x8xf32>
    %118 = arith.addf %113, %117 : vector<8x8xf32>
    %c0_83 = arith.constant 0 : index
    %c0_84 = arith.constant 0 : index
    %c24 = arith.constant 24 : index
    %119 = vector.load %arg5[%c0_83, %c0_84, %c24] : memref<1x8x64xf32, #tpu.memory_space<vmem>>, vector<1x8x8xf32>
    %120 = vector.shape_cast %119 : vector<1x8x8xf32> to vector<8x8xf32>
    %121 = vector.shape_cast %118 : vector<8x8xf32> to vector<1x8x8xf32>
    tpu.vector_store %arg5[%c0_83, %c0_84, %c24], %121 {strides = array<i32>} : memref<1x8x64xf32, #tpu.memory_space<vmem>>, vector<1x8x8xf32>,
    %cst_85 = arith.constant dense<0.000000e+00> : vector<8xf32>
    %122 = vector.multi_reduction <add>, %118, %cst_85 [1] : vector<8x8xf32> to vector<8xf32>
    %123 = vector.shape_cast %122 : vector<8xf32> to vector<8x1xf32>
    %124 = arith.addf %93, %123 : vector<8x1xf32>
    %125 = arith.mulf %118, %118 : vector<8x8xf32>
    %cst_86 = arith.constant dense<0.000000e+00> : vector<8xf32>
    %126 = vector.multi_reduction <add>, %125, %cst_86 [1] : vector<8x8xf32> to vector<8xf32>
    %127 = vector.shape_cast %126 : vector<8xf32> to vector<8x1xf32>
    %128 = arith.addf %97, %127 : vector<8x1xf32>
    %129 = vector.extract_strided_slice %1 {offsets = [0, 128], sizes = [4, 32], strides = [1, 1]} : vector<4x256xf32> to vector<4x32xf32>
    %cst_87 = arith.constant dense<0.000000e+00> : vector<4x32xf32>
    %130 = tpu.matmul %129, %2, %cst_87 {dimension_numbers = #tpu.dot_dimension_numbers<[1], [0], [0], [1], [0, 0, 1, 1], [], []>} : vector<4x32xf32>, vector<32x32xf32>, vector<4x32xf32> -> vector<4x32xf32>
    %c0_88 = arith.constant 0 : index
    %c0_89 = arith.constant 0 : index
    %c0_90 = arith.constant 0 : index
    %131 = vector.load %arg3[%c0_88, %c0_89, %c0_90] : memref<4x8x4xf32, #tpu.memory_space<vmem>>, vector<1x8x4xf32>
    %132 = vector.shape_cast %131 : vector<1x8x4xf32> to vector<8x4xf32>
    %133 = vector.extract_strided_slice %130 {offsets = [0, 0], sizes = [4, 8], strides = [1, 1]} : vector<4x32xf32> to vector<4x8xf32>
    %cst_91 = arith.constant dense<0.000000e+00> : vector<8x8xf32>
    %134 = tpu.matmul %132, %133, %cst_91 {dimension_numbers = #tpu.dot_dimension_numbers<[1], [0], [0], [1], [0, 0, 1, 1], [], []>} : vector<8x4xf32>, vector<4x8xf32>, vector<8x8xf32> -> vector<8x8xf32>
    %c1_92 = arith.constant 1 : index
    %c0_93 = arith.constant 0 : index
    %c0_94 = arith.constant 0 : index
    %135 = vector.load %arg3[%c1_92, %c0_93, %c0_94] : memref<4x8x4xf32, #tpu.memory_space<vmem>>, vector<1x8x4xf32>
    %136 = vector.shape_cast %135 : vector<1x8x4xf32> to vector<8x4xf32>
    %137 = vector.extract_strided_slice %130 {offsets = [0, 8], sizes = [4, 8], strides = [1, 1]} : vector<4x32xf32> to vector<4x8xf32>
    %cst_95 = arith.constant dense<0.000000e+00> : vector<8x8xf32>
    %138 = tpu.matmul %136, %137, %cst_95 {dimension_numbers = #tpu.dot_dimension_numbers<[1], [0], [0], [1], [0, 0, 1, 1], [], []>} : vector<8x4xf32>, vector<4x8xf32>, vector<8x8xf32> -> vector<8x8xf32>
    %139 = arith.addf %134, %138 : vector<8x8xf32>
    %c2_96 = arith.constant 2 : index
    %c0_97 = arith.constant 0 : index
    %c0_98 = arith.constant 0 : index
    %140 = vector.load %arg3[%c2_96, %c0_97, %c0_98] : memref<4x8x4xf32, #tpu.memory_space<vmem>>, vector<1x8x4xf32>
    %141 = vector.shape_cast %140 : vector<1x8x4xf32> to vector<8x4xf32>
    %142 = vector.extract_strided_slice %130 {offsets = [0, 16], sizes = [4, 8], strides = [1, 1]} : vector<4x32xf32> to vector<4x8xf32>
    %cst_99 = arith.constant dense<0.000000e+00> : vector<8x8xf32>
    %143 = tpu.matmul %141, %142, %cst_99 {dimension_numbers = #tpu.dot_dimension_numbers<[1], [0], [0], [1], [0, 0, 1, 1], [], []>} : vector<8x4xf32>, vector<4x8xf32>, vector<8x8xf32> -> vector<8x8xf32>
    %144 = arith.addf %139, %143 : vector<8x8xf32>
    %c3_100 = arith.constant 3 : index
    %c0_101 = arith.constant 0 : index
    %c0_102 = arith.constant 0 : index
    %145 = vector.load %arg3[%c3_100, %c0_101, %c0_102] : memref<4x8x4xf32, #tpu.memory_space<vmem>>, vector<1x8x4xf32>
    %146 = vector.shape_cast %145 : vector<1x8x4xf32> to vector<8x4xf32>
    %147 = vector.extract_strided_slice %130 {offsets = [0, 24], sizes = [4, 8], strides = [1, 1]} : vector<4x32xf32> to vector<4x8xf32>
    %cst_103 = arith.constant dense<0.000000e+00> : vector<8x8xf32>
    %148 = tpu.matmul %146, %147, %cst_103 {dimension_numbers = #tpu.dot_dimension_numbers<[1], [0], [0], [1], [0, 0, 1, 1], [], []>} : vector<8x4xf32>, vector<4x8xf32>, vector<8x8xf32> -> vector<8x8xf32>
    %149 = arith.addf %144, %148 : vector<8x8xf32>
    %c0_104 = arith.constant 0 : index
    %c0_105 = arith.constant 0 : index
    %c32 = arith.constant 32 : index
    %150 = vector.load %arg5[%c0_104, %c0_105, %c32] : memref<1x8x64xf32, #tpu.memory_space<vmem>>, vector<1x8x8xf32>
    %151 = vector.shape_cast %150 : vector<1x8x8xf32> to vector<8x8xf32>
    %152 = vector.shape_cast %149 : vector<8x8xf32> to vector<1x8x8xf32>
    tpu.vector_store %arg5[%c0_104, %c0_105, %c32], %152 {strides = array<i32>} : memref<1x8x64xf32, #tpu.memory_space<vmem>>, vector<1x8x8xf32>,
    %cst_106 = arith.constant dense<0.000000e+00> : vector<8xf32>
    %153 = vector.multi_reduction <add>, %149, %cst_106 [1] : vector<8x8xf32> to vector<8xf32>
    %154 = vector.shape_cast %153 : vector<8xf32> to vector<8x1xf32>
    %155 = arith.addf %124, %154 : vector<8x1xf32>
    %156 = arith.mulf %149, %149 : vector<8x8xf32>
    %cst_107 = arith.constant dense<0.000000e+00> : vector<8xf32>
    %157 = vector.multi_reduction <add>, %156, %cst_107 [1] : vector<8x8xf32> to vector<8xf32>
    %158 = vector.shape_cast %157 : vector<8xf32> to vector<8x1xf32>
    %159 = arith.addf %128, %158 : vector<8x1xf32>
    %160 = vector.extract_strided_slice %1 {offsets = [0, 160], sizes = [4, 32], strides = [1, 1]} : vector<4x256xf32> to vector<4x32xf32>
    %cst_108 = arith.constant dense<0.000000e+00> : vector<4x32xf32>
    %161 = tpu.matmul %160, %2, %cst_108 {dimension_numbers = #tpu.dot_dimension_numbers<[1], [0], [0], [1], [0, 0, 1, 1], [], []>} : vector<4x32xf32>, vector<32x32xf32>, vector<4x32xf32> -> vector<4x32xf32>
    %c0_109 = arith.constant 0 : index
    %c0_110 = arith.constant 0 : index
    %c0_111 = arith.constant 0 : index
    %162 = vector.load %arg3[%c0_109, %c0_110, %c0_111] : memref<4x8x4xf32, #tpu.memory_space<vmem>>, vector<1x8x4xf32>
    %163 = vector.shape_cast %162 : vector<1x8x4xf32> to vector<8x4xf32>
    %164 = vector.extract_strided_slice %161 {offsets = [0, 0], sizes = [4, 8], strides = [1, 1]} : vector<4x32xf32> to vector<4x8xf32>
    %cst_112 = arith.constant dense<0.000000e+00> : vector<8x8xf32>
    %165 = tpu.matmul %163, %164, %cst_112 {dimension_numbers = #tpu.dot_dimension_numbers<[1], [0], [0], [1], [0, 0, 1, 1], [], []>} : vector<8x4xf32>, vector<4x8xf32>, vector<8x8xf32> -> vector<8x8xf32>
    %c1_113 = arith.constant 1 : index
    %c0_114 = arith.constant 0 : index
    %c0_115 = arith.constant 0 : index
    %166 = vector.load %arg3[%c1_113, %c0_114, %c0_115] : memref<4x8x4xf32, #tpu.memory_space<vmem>>, vector<1x8x4xf32>
    %167 = vector.shape_cast %166 : vector<1x8x4xf32> to vector<8x4xf32>
    %168 = vector.extract_strided_slice %161 {offsets = [0, 8], sizes = [4, 8], strides = [1, 1]} : vector<4x32xf32> to vector<4x8xf32>
    %cst_116 = arith.constant dense<0.000000e+00> : vector<8x8xf32>
    %169 = tpu.matmul %167, %168, %cst_116 {dimension_numbers = #tpu.dot_dimension_numbers<[1], [0], [0], [1], [0, 0, 1, 1], [], []>} : vector<8x4xf32>, vector<4x8xf32>, vector<8x8xf32> -> vector<8x8xf32>
    %170 = arith.addf %165, %169 : vector<8x8xf32>
    %c2_117 = arith.constant 2 : index
    %c0_118 = arith.constant 0 : index
    %c0_119 = arith.constant 0 : index
    %171 = vector.load %arg3[%c2_117, %c0_118, %c0_119] : memref<4x8x4xf32, #tpu.memory_space<vmem>>, vector<1x8x4xf32>
    %172 = vector.shape_cast %171 : vector<1x8x4xf32> to vector<8x4xf32>
    %173 = vector.extract_strided_slice %161 {offsets = [0, 16], sizes = [4, 8], strides = [1, 1]} : vector<4x32xf32> to vector<4x8xf32>
    %cst_120 = arith.constant dense<0.000000e+00> : vector<8x8xf32>
    %174 = tpu.matmul %172, %173, %cst_120 {dimension_numbers = #tpu.dot_dimension_numbers<[1], [0], [0], [1], [0, 0, 1, 1], [], []>} : vector<8x4xf32>, vector<4x8xf32>, vector<8x8xf32> -> vector<8x8xf32>
    %175 = arith.addf %170, %174 : vector<8x8xf32>
    %c3_121 = arith.constant 3 : index
    %c0_122 = arith.constant 0 : index
    %c0_123 = arith.constant 0 : index
    %176 = vector.load %arg3[%c3_121, %c0_122, %c0_123] : memref<4x8x4xf32, #tpu.memory_space<vmem>>, vector<1x8x4xf32>
    %177 = vector.shape_cast %176 : vector<1x8x4xf32> to vector<8x4xf32>
    %178 = vector.extract_strided_slice %161 {offsets = [0, 24], sizes = [4, 8], strides = [1, 1]} : vector<4x32xf32> to vector<4x8xf32>
    %cst_124 = arith.constant dense<0.000000e+00> : vector<8x8xf32>
    %179 = tpu.matmul %177, %178, %cst_124 {dimension_numbers = #tpu.dot_dimension_numbers<[1], [0], [0], [1], [0, 0, 1, 1], [], []>} : vector<8x4xf32>, vector<4x8xf32>, vector<8x8xf32> -> vector<8x8xf32>
    %180 = arith.addf %175, %179 : vector<8x8xf32>
    %c0_125 = arith.constant 0 : index
    %c0_126 = arith.constant 0 : index
    %c40 = arith.constant 40 : index
    %181 = vector.load %arg5[%c0_125, %c0_126, %c40] : memref<1x8x64xf32, #tpu.memory_space<vmem>>, vector<1x8x8xf32>
    %182 = vector.shape_cast %181 : vector<1x8x8xf32> to vector<8x8xf32>
    %183 = vector.shape_cast %180 : vector<8x8xf32> to vector<1x8x8xf32>
    tpu.vector_store %arg5[%c0_125, %c0_126, %c40], %183 {strides = array<i32>} : memref<1x8x64xf32, #tpu.memory_space<vmem>>, vector<1x8x8xf32>,
    %cst_127 = arith.constant dense<0.000000e+00> : vector<8xf32>
    %184 = vector.multi_reduction <add>, %180, %cst_127 [1] : vector<8x8xf32> to vector<8xf32>
    %185 = vector.shape_cast %184 : vector<8xf32> to vector<8x1xf32>
    %186 = arith.addf %155, %185 : vector<8x1xf32>
    %187 = arith.mulf %180, %180 : vector<8x8xf32>
    %cst_128 = arith.constant dense<0.000000e+00> : vector<8xf32>
    %188 = vector.multi_reduction <add>, %187, %cst_128 [1] : vector<8x8xf32> to vector<8xf32>
    %189 = vector.shape_cast %188 : vector<8xf32> to vector<8x1xf32>
    %190 = arith.addf %159, %189 : vector<8x1xf32>
    %191 = vector.extract_strided_slice %1 {offsets = [0, 192], sizes = [4, 32], strides = [1, 1]} : vector<4x256xf32> to vector<4x32xf32>
    %cst_129 = arith.constant dense<0.000000e+00> : vector<4x32xf32>
    %192 = tpu.matmul %191, %2, %cst_129 {dimension_numbers = #tpu.dot_dimension_numbers<[1], [0], [0], [1], [0, 0, 1, 1], [], []>} : vector<4x32xf32>, vector<32x32xf32>, vector<4x32xf32> -> vector<4x32xf32>
    %c0_130 = arith.constant 0 : index
    %c0_131 = arith.constant 0 : index
    %c0_132 = arith.constant 0 : index
    %193 = vector.load %arg3[%c0_130, %c0_131, %c0_132] : memref<4x8x4xf32, #tpu.memory_space<vmem>>, vector<1x8x4xf32>
    %194 = vector.shape_cast %193 : vector<1x8x4xf32> to vector<8x4xf32>
    %195 = vector.extract_strided_slice %192 {offsets = [0, 0], sizes = [4, 8], strides = [1, 1]} : vector<4x32xf32> to vector<4x8xf32>
    %cst_133 = arith.constant dense<0.000000e+00> : vector<8x8xf32>
    %196 = tpu.matmul %194, %195, %cst_133 {dimension_numbers = #tpu.dot_dimension_numbers<[1], [0], [0], [1], [0, 0, 1, 1], [], []>} : vector<8x4xf32>, vector<4x8xf32>, vector<8x8xf32> -> vector<8x8xf32>
    %c1_134 = arith.constant 1 : index
    %c0_135 = arith.constant 0 : index
    %c0_136 = arith.constant 0 : index
    %197 = vector.load %arg3[%c1_134, %c0_135, %c0_136] : memref<4x8x4xf32, #tpu.memory_space<vmem>>, vector<1x8x4xf32>
    %198 = vector.shape_cast %197 : vector<1x8x4xf32> to vector<8x4xf32>
    %199 = vector.extract_strided_slice %192 {offsets = [0, 8], sizes = [4, 8], strides = [1, 1]} : vector<4x32xf32> to vector<4x8xf32>
    %cst_137 = arith.constant dense<0.000000e+00> : vector<8x8xf32>
    %200 = tpu.matmul %198, %199, %cst_137 {dimension_numbers = #tpu.dot_dimension_numbers<[1], [0], [0], [1], [0, 0, 1, 1], [], []>} : vector<8x4xf32>, vector<4x8xf32>, vector<8x8xf32> -> vector<8x8xf32>
    %201 = arith.addf %196, %200 : vector<8x8xf32>
    %c2_138 = arith.constant 2 : index
    %c0_139 = arith.constant 0 : index
    %c0_140 = arith.constant 0 : index
    %202 = vector.load %arg3[%c2_138, %c0_139, %c0_140] : memref<4x8x4xf32, #tpu.memory_space<vmem>>, vector<1x8x4xf32>
    %203 = vector.shape_cast %202 : vector<1x8x4xf32> to vector<8x4xf32>
    %204 = vector.extract_strided_slice %192 {offsets = [0, 16], sizes = [4, 8], strides = [1, 1]} : vector<4x32xf32> to vector<4x8xf32>
    %cst_141 = arith.constant dense<0.000000e+00> : vector<8x8xf32>
    %205 = tpu.matmul %203, %204, %cst_141 {dimension_numbers = #tpu.dot_dimension_numbers<[1], [0], [0], [1], [0, 0, 1, 1], [], []>} : vector<8x4xf32>, vector<4x8xf32>, vector<8x8xf32> -> vector<8x8xf32>
    %206 = arith.addf %201, %205 : vector<8x8xf32>
    %c3_142 = arith.constant 3 : index
    %c0_143 = arith.constant 0 : index
    %c0_144 = arith.constant 0 : index
    %207 = vector.load %arg3[%c3_142, %c0_143, %c0_144] : memref<4x8x4xf32, #tpu.memory_space<vmem>>, vector<1x8x4xf32>
    %208 = vector.shape_cast %207 : vector<1x8x4xf32> to vector<8x4xf32>
    %209 = vector.extract_strided_slice %192 {offsets = [0, 24], sizes = [4, 8], strides = [1, 1]} : vector<4x32xf32> to vector<4x8xf32>
    %cst_145 = arith.constant dense<0.000000e+00> : vector<8x8xf32>
    %210 = tpu.matmul %208, %209, %cst_145 {dimension_numbers = #tpu.dot_dimension_numbers<[1], [0], [0], [1], [0, 0, 1, 1], [], []>} : vector<8x4xf32>, vector<4x8xf32>, vector<8x8xf32> -> vector<8x8xf32>
    %211 = arith.addf %206, %210 : vector<8x8xf32>
    %c0_146 = arith.constant 0 : index
    %c0_147 = arith.constant 0 : index
    %c48 = arith.constant 48 : index
    %212 = vector.load %arg5[%c0_146, %c0_147, %c48] : memref<1x8x64xf32, #tpu.memory_space<vmem>>, vector<1x8x8xf32>
    %213 = vector.shape_cast %212 : vector<1x8x8xf32> to vector<8x8xf32>
    %214 = vector.shape_cast %211 : vector<8x8xf32> to vector<1x8x8xf32>
    tpu.vector_store %arg5[%c0_146, %c0_147, %c48], %214 {strides = array<i32>} : memref<1x8x64xf32, #tpu.memory_space<vmem>>, vector<1x8x8xf32>,
    %cst_148 = arith.constant dense<0.000000e+00> : vector<8xf32>
    %215 = vector.multi_reduction <add>, %211, %cst_148 [1] : vector<8x8xf32> to vector<8xf32>
    %216 = vector.shape_cast %215 : vector<8xf32> to vector<8x1xf32>
    %217 = arith.addf %186, %216 : vector<8x1xf32>
    %218 = arith.mulf %211, %211 : vector<8x8xf32>
    %cst_149 = arith.constant dense<0.000000e+00> : vector<8xf32>
    %219 = vector.multi_reduction <add>, %218, %cst_149 [1] : vector<8x8xf32> to vector<8xf32>
    %220 = vector.shape_cast %219 : vector<8xf32> to vector<8x1xf32>
    %221 = arith.addf %190, %220 : vector<8x1xf32>
    %222 = vector.extract_strided_slice %1 {offsets = [0, 224], sizes = [4, 32], strides = [1, 1]} : vector<4x256xf32> to vector<4x32xf32>
    %cst_150 = arith.constant dense<0.000000e+00> : vector<4x32xf32>
    %223 = tpu.matmul %222, %2, %cst_150 {dimension_numbers = #tpu.dot_dimension_numbers<[1], [0], [0], [1], [0, 0, 1, 1], [], []>} : vector<4x32xf32>, vector<32x32xf32>, vector<4x32xf32> -> vector<4x32xf32>
    %c0_151 = arith.constant 0 : index
    %c0_152 = arith.constant 0 : index
    %c0_153 = arith.constant 0 : index
    %224 = vector.load %arg3[%c0_151, %c0_152, %c0_153] : memref<4x8x4xf32, #tpu.memory_space<vmem>>, vector<1x8x4xf32>
    %225 = vector.shape_cast %224 : vector<1x8x4xf32> to vector<8x4xf32>
    %226 = vector.extract_strided_slice %223 {offsets = [0, 0], sizes = [4, 8], strides = [1, 1]} : vector<4x32xf32> to vector<4x8xf32>
    %cst_154 = arith.constant dense<0.000000e+00> : vector<8x8xf32>
    %227 = tpu.matmul %225, %226, %cst_154 {dimension_numbers = #tpu.dot_dimension_numbers<[1], [0], [0], [1], [0, 0, 1, 1], [], []>} : vector<8x4xf32>, vector<4x8xf32>, vector<8x8xf32> -> vector<8x8xf32>
    %c1_155 = arith.constant 1 : index
    %c0_156 = arith.constant 0 : index
    %c0_157 = arith.constant 0 : index
    %228 = vector.load %arg3[%c1_155, %c0_156, %c0_157] : memref<4x8x4xf32, #tpu.memory_space<vmem>>, vector<1x8x4xf32>
    %229 = vector.shape_cast %228 : vector<1x8x4xf32> to vector<8x4xf32>
    %230 = vector.extract_strided_slice %223 {offsets = [0, 8], sizes = [4, 8], strides = [1, 1]} : vector<4x32xf32> to vector<4x8xf32>
    %cst_158 = arith.constant dense<0.000000e+00> : vector<8x8xf32>
    %231 = tpu.matmul %229, %230, %cst_158 {dimension_numbers = #tpu.dot_dimension_numbers<[1], [0], [0], [1], [0, 0, 1, 1], [], []>} : vector<8x4xf32>, vector<4x8xf32>, vector<8x8xf32> -> vector<8x8xf32>
    %232 = arith.addf %227, %231 : vector<8x8xf32>
    %c2_159 = arith.constant 2 : index
    %c0_160 = arith.constant 0 : index
    %c0_161 = arith.constant 0 : index
    %233 = vector.load %arg3[%c2_159, %c0_160, %c0_161] : memref<4x8x4xf32, #tpu.memory_space<vmem>>, vector<1x8x4xf32>
    %234 = vector.shape_cast %233 : vector<1x8x4xf32> to vector<8x4xf32>
    %235 = vector.extract_strided_slice %223 {offsets = [0, 16], sizes = [4, 8], strides = [1, 1]} : vector<4x32xf32> to vector<4x8xf32>
    %cst_162 = arith.constant dense<0.000000e+00> : vector<8x8xf32>
    %236 = tpu.matmul %234, %235, %cst_162 {dimension_numbers = #tpu.dot_dimension_numbers<[1], [0], [0], [1], [0, 0, 1, 1], [], []>} : vector<8x4xf32>, vector<4x8xf32>, vector<8x8xf32> -> vector<8x8xf32>
    %237 = arith.addf %232, %236 : vector<8x8xf32>
    %c3_163 = arith.constant 3 : index
    %c0_164 = arith.constant 0 : index
    %c0_165 = arith.constant 0 : index
    %238 = vector.load %arg3[%c3_163, %c0_164, %c0_165] : memref<4x8x4xf32, #tpu.memory_space<vmem>>, vector<1x8x4xf32>
    %239 = vector.shape_cast %238 : vector<1x8x4xf32> to vector<8x4xf32>
    %240 = vector.extract_strided_slice %223 {offsets = [0, 24], sizes = [4, 8], strides = [1, 1]} : vector<4x32xf32> to vector<4x8xf32>
    %cst_166 = arith.constant dense<0.000000e+00> : vector<8x8xf32>
    %241 = tpu.matmul %239, %240, %cst_166 {dimension_numbers = #tpu.dot_dimension_numbers<[1], [0], [0], [1], [0, 0, 1, 1], [], []>} : vector<8x4xf32>, vector<4x8xf32>, vector<8x8xf32> -> vector<8x8xf32>
    %242 = arith.addf %237, %241 : vector<8x8xf32>
    %c0_167 = arith.constant 0 : index
    %c0_168 = arith.constant 0 : index
    %c56 = arith.constant 56 : index
    %243 = vector.load %arg5[%c0_167, %c0_168, %c56] : memref<1x8x64xf32, #tpu.memory_space<vmem>>, vector<1x8x8xf32>
    %244 = vector.shape_cast %243 : vector<1x8x8xf32> to vector<8x8xf32>
    %245 = vector.shape_cast %242 : vector<8x8xf32> to vector<1x8x8xf32>
    tpu.vector_store %arg5[%c0_167, %c0_168, %c56], %245 {strides = array<i32>} : memref<1x8x64xf32, #tpu.memory_space<vmem>>, vector<1x8x8xf32>,
    %cst_169 = arith.constant dense<0.000000e+00> : vector<8xf32>
    %246 = vector.multi_reduction <add>, %242, %cst_169 [1] : vector<8x8xf32> to vector<8xf32>
    %247 = vector.shape_cast %246 : vector<8xf32> to vector<8x1xf32>
    %248 = arith.addf %217, %247 : vector<8x1xf32>
    %249 = arith.mulf %242, %242 : vector<8x8xf32>
    %cst_170 = arith.constant dense<0.000000e+00> : vector<8xf32>
    %250 = vector.multi_reduction <add>, %249, %cst_170 [1] : vector<8x8xf32> to vector<8xf32>
    %251 = vector.shape_cast %250 : vector<8xf32> to vector<8x1xf32>
    %252 = arith.addf %221, %251 : vector<8x1xf32>
    %c0_171 = arith.constant 0 : index
    %c0_172 = arith.constant 0 : index
    %c0_173 = arith.constant 0 : index
    %c0_174 = arith.constant 0 : index
    %253 = vector.load %arg6[%c0_171, %c0_172, %c0_173, %c0_174] : memref<1x1x8x2xf32, #tpu.memory_space<vmem>>, vector<1x1x8x1xf32>
    %254 = vector.shape_cast %253 : vector<1x1x8x1xf32> to vector<8x1xf32>
    %255 = vector.shape_cast %248 : vector<8x1xf32> to vector<1x1x8x1xf32>
    tpu.vector_store %arg6[%c0_171, %c0_172, %c0_173, %c0_174], %255 {strides = array<i32>} : memref<1x1x8x2xf32, #tpu.memory_space<vmem>>, vector<1x1x8x1xf32>,
    %c0_175 = arith.constant 0 : index
    %c0_176 = arith.constant 0 : index
    %c0_177 = arith.constant 0 : index
    %c1_178 = arith.constant 1 : index
    %256 = vector.load %arg6[%c0_175, %c0_176, %c0_177, %c1_178] : memref<1x1x8x2xf32, #tpu.memory_space<vmem>>, vector<1x1x8x1xf32>
    %257 = vector.shape_cast %256 : vector<1x1x8x1xf32> to vector<8x1xf32>
    %258 = vector.shape_cast %252 : vector<8x1xf32> to vector<1x1x8x1xf32>
    tpu.vector_store %arg6[%c0_175, %c0_176, %c0_177, %c1_178], %258 {strides = array<i32>} : memref<1x1x8x2xf32, #tpu.memory_space<vmem>>, vector<1x1x8x1xf32>,
    return
  }
  func.func @transform_0(%arg0: i32, %arg1: i32) -> (i32, i32, i32) {
    %c0_i32 = arith.constant 0 : i32
    %c0_i32_0 = arith.constant 0 : i32
    return %arg0, %c0_i32, %arg1 : i32, i32, i32
  }
  func.func @transform_1(%arg0: i32, %arg1: i32) -> (i32, i32, i32) {
    %c0_i32 = arith.constant 0 : i32
    %c0_i32_0 = arith.constant 0 : i32
    %c0_i32_1 = arith.constant 0 : i32
    %c0_i32_2 = arith.constant 0 : i32
    return %c0_i32, %c0_i32_0, %c0_i32_1 : i32, i32, i32
  }
  func.func @transform_2(%arg0: i32, %arg1: i32) -> (i32, i32) {
    %c0_i32 = arith.constant 0 : i32
    %c0_i32_0 = arith.constant 0 : i32
    %c0_i32_1 = arith.constant 0 : i32
    return %c0_i32, %c0_i32_0 : i32, i32
  }
  func.func @transform_3(%arg0: i32, %arg1: i32) -> (i32, i32, i32) {
    %c0_i32 = arith.constant 0 : i32
    %c0_i32_0 = arith.constant 0 : i32
    return %arg0, %c0_i32, %arg1 : i32, i32, i32
  }
  func.func @transform_4(%arg0: i32, %arg1: i32) -> (i32, i32, i32, i32) {
    %c0_i32 = arith.constant 0 : i32
    %c0_i32_0 = arith.constant 0 : i32
    %c0_i32_1 = arith.constant 0 : i32
    return %arg0, %arg1, %c0_i32, %c0_i32_0 : i32, i32, i32, i32
  }
}

</mosaic_0001>

<bundles_post_ra>
// kernel: convolution_downsample.3
= control target key start
LH: loop header
LB: loop body
LE: loop exit
PB: predicated region body
PF: predicated region fallthrough
CT: control target
= control target key end

     0   :  { %s369_s12 = smov 0   ;;  %s371_s13 = smov 0   ;;  %s405_s0 = inlined_call_operand.vmem [shape: f32[2,8,64], index: 0, kind: input, shape index: {}]   ;;  %s406_s1 = inlined_call_operand.vmem [shape: f32[8,1], index: 1, kind: input, shape index: {}]   ;;  %s407_s2 = inlined_call_operand.vmem [shape: f32[8,1], index: 2, kind: input, shape index: {}]   ;;  %s408_s3 = inlined_call_operand.vmem [shape: f32[2,8,64], index: 3, kind: output, shape index: {}]  }
   0x1   :  { %s373_s14 = smov 0  }
   0x2 LB: > { %s25_s15 = sadd.s32 1, %s342_s13  ;;  %p293_p0 = scmp.ge.s32.totalorder %s346_s14, 1  ;;  %s346_s14 = sphi %s373_s14, %s13_s14   ;;  %s342_s13 = sphi %s371_s13, %s410_s13   ;;  %s338_s12 = sphi %s369_s12, %s409_s12  }
   0x3   : > { %p27_p1 = scmp.ge.s32.totalorder %s25_s15, 2  ;;  %p155_p2 = scmp.lt.s32.totalorder %s346_s14, 3 }
   0x5   : > { %s412_s15 = smov (%p27_p1, %s25_s15), 0  ;;  %p156_p3 = pnand %p293_p0, %p155_p2 }
   0x6   : > { %p183_p4 = scmp.lt.s32.totalorder (!%p156_p3), %s338_s12, 1 }
   0x7   : > { %159 = sbr.rel (%p156_p3) target bundleno = 142 (0x8e), region = 32 }
   0xc   : > { %v198_v0 = vld [vmem:[%s406_s1] sm:$0xff]  ;;  %v348_v1 = vmov 0   ;;  %s414_s12 = smov (!%p183_p4, %s338_s12), 1  ;;  %vm213_vm0 = vcmask 523264  }
   0xd   : > { %323 = vset.pattern.permute.xlu0 %v348_v1  ;;  %v205_v2 = vld [vmem:[%s407_s2] sm:$0xff]  ;;  %s294_s20 = sshll.u32 %s414_s12, 3 }
   0xe   : > { %201 = vperm.xlu0 %323, %v198_v0   ;;  %s189_s23 = scalar_lea.vmem %s405_s0, %s294_s20  ;;  %s196_s26 = scalar_lea.vmem %s408_s3, %s294_s20 }
   0xf   : > { %v197_v4 = vld [vmem:[%s189_s23] sm:$0xff] }
  0x16   : > { %208 = vperm.xlu0 %323, %v205_v2  }
  0x80   : > { %v202_v3 = vpop.permute.xlu0 %201 }
  0x81   : > { %v204_v5 = vmul.f32 %v202_v3, %v197_v4 }
  0x88   : > { %v209_v6 = vpop.permute.xlu0 %208 }
  0x89   : > { %v211_v7 = vadd.f32 %v209_v6, %v204_v5 }
  0x8b   : > { %v212_v8 = vmax.f32 %v211_v7, 0.0 }
  0x8d   : > { %214 = vst.msk [vmem:[%s196_s26] sm:$0xff] %vm213_vm0, %v212_v8 }
  0x8e PF: > { %s13_s14 = sadd.s32 1, %s346_s14   ;;  %s409_s12 = smov %s342_s13 }
  0x8f   : > { %p10_p5 = scmp.ge.s32.totalorder %s13_s14, 4   ;;  %s410_s13 = smov %s412_s15 }
  0x91   :  { %12 = sbr.rel (!%p10_p5) target bundleno = 2 (0x2), region = 62 }

// kernel: convolution_downsample.2
= control target key start
LH: loop header
LB: loop body
LE: loop exit
PB: predicated region body
PF: predicated region fallthrough
CT: control target
= control target key end

     0   :  { %s1812_s15 = smov 0   ;;  %s1814_s16 = smov 0   ;;  %s2127_s0 = inlined_call_operand.vmem [shape: f32[2,4,256], index: 0, kind: input, shape index: {}]   ;;  %s2128_s1 = inlined_call_operand.vmem [shape: f32[4,8,4], index: 1, kind: input, shape index: {}]   ;;  %s2129_s2 = inlined_call_operand.vmem [shape: f32[32,32], index: 2, kind: input, shape index: {}]   ;;  %s2130_s3 = inlined_call_operand.vmem [shape: f32[2,8,64], index: 3, kind: output, shape index: {0}]   ;;  %s2131_s4 = inlined_call_operand.vmem [shape: f32[2,1,8,2], index: 4, kind: output, shape index: {1}]  }
   0x1   :  { %s1816_s17 = smov 0  }
   0x2 LB: > { %s27_s18 = sadd.s32 1, %s1769_s16  ;;  %p1611_p0 = scmp.ge.s32.totalorder %s1773_s17, 1  ;;  %s1773_s17 = sphi %s1816_s17, %s15_s17   ;;  %s1769_s16 = sphi %s1814_s16, %s2133_s16   ;;  %s1765_s15 = sphi %s1812_s15, %s2132_s15  }
   0x3   : > { %p29_p1 = scmp.ge.s32.totalorder %s27_s18, 2  ;;  %p188_p2 = scmp.lt.s32.totalorder %s1773_s17, 3 }
   0x5   : > { %s2135_s18 = smov (%p29_p1, %s27_s18), 0  ;;  %p189_p3 = pnand %p1611_p0, %p188_p2 }
   0x6   : > { %p228_p4 = scmp.lt.s32.totalorder (!%p189_p3), %s1765_s15, 1  ;;  %s1775_s5 = smov (!%p189_p3), 96  }
   0x7   : > { %192 = sbr.rel (%p189_p3) target bundleno = 2152 (0x868), region = 32  ;;  %s1776_s8 = smov (!%p189_p3), 112  }
   0x8   : > { %s1777_s9 = smov (!%p189_p3), 120   ;;  %s1778_s14 = smov (!%p189_p3), 64  }
   0x9   : > { %s1780_s24 = smov (!%p189_p3), 32   ;;  %s1781_s25 = smov (!%p189_p3), 8  }
   0xa   : > { %s1782_s26 = smov (!%p189_p3), 16   ;;  %s1783_s28 = smov (!%p189_p3), 24  }
   0xb   : > { %s1784_s29 = smov (!%p189_p3), 40  }
   0xc   : > { %v1833_v0 = vld [vmem:[%s2129_s2 + $0x18] sm:$0xff]  ;;  %v1838_v1 = vld [vmem:[%s2129_s2 + $0x10] sm:$0xff]  ;;  %v1844_v2 = vld [vmem:[%s2129_s2 + $0x8] sm:$0xff]  ;;  %s2137_s15 = smov (!%p228_p4, %s1765_s15), 1  ;;  %vm256_vm0 = vcmask 261120   ;;  %vm290_vm1 = vcmask 1043456  }
   0xd   : > { %272 = vmatpush.msra.mxu0 %v1833_v0  ;;  %v1850_v3 = vld [vmem:[%s2129_s2] sm:$0xff]  ;;  %s1852_s27 = sshll.u32 %s2137_s15, 3  ;;  %vm286_vm2 = vcmask 31744   ;;  %v1886_v10 = vld [vmem:[%s2128_s1 + $0x10] sm:$0xff]  ;;  %v1894_v12 = vld [vmem:[%s2128_s1 + $0x8] sm:$0xff]  ;;  %s1779_s15 = smov 104  }
   0xe   : > { %s235_s30 = scalar_lea.vmem %s2127_s0, %s1852_s27  ;;  %v1870_v6 = vld [vmem:[%s2128_s1] sm:$0xff]  ;;  %v1917_v18 = vld [vmem:[%s2128_s1 + $0x18] sm:$0xff]  ;;  %s1931_s23 = scalar_lea.vmem %s2130_s3, %s1852_s27  ;;  %vm398_vm3 = vcmask 64512   ;;  %vm552_vm4 = vcmask 130112   ;;  %vm706_vm5 = vcmask 195712   ;;  %vm860_vm6 = vcmask 261312  }
   0xf   : > { %273 = vmatpush.msra.mxu0 %v1838_v1  ;;  %v1859_v4 = vld [vmem:[%s235_s30] sm:$0xff]  ;;  %s1785_s30 = smov 48   ;;  %vm1012_vm7 = vcmask 326912   ;;  %vm1166_vm8 = vcmask 392512   ;;  %vm1320_vm9 = vcmask 458112   ;;  %vm1485_vm10 = vcmask 7168  }
  0x10   : > { %409 = vst [vmem:[#allocation1] ss:$2 sm:$0xff] %v1859_v4  ;;  %vm1487_vm11 = vcmask 15368   ;;  %vm1474_vm12 = vcmask 523712  }
  0x11   : > { %274 = vmatpush.msra.mxu0 %v1844_v2 }
  0x13   : > { %275 = vmatpush.msra.mxu0 %v1850_v3 }
  0x14   : > { %1616 = vmatmul.msk.f32.vlgmr.msra.gmra.mxu0 %vm256_vm0, %v1859_v4 }
  0x17   : > { %v410_v5 = vld.sshfl [vmem:[#allocation1] sm:$0xff pattern:$0x75316420] }
  0x18   : > { %411 = vrot.lane.b32.xlu0 %v410_v5, %s1775_s5  ;;  %563 = vst [vmem:[#allocation1] ss:$2 sm:$0xff] %v1859_v4 }
  0x1f   : > { %v564_v9 = vld.sshfl [vmem:[#allocation1] sm:$0xff pattern:$0x75316420] }
  0x20   : > { %717 = vst [vmem:[#allocation1] ss:$2 sm:$0xff] %v1859_v4 }
  0x27   : > { %v718_v21 = vld.sshfl [vmem:[#allocation1] sm:$0xff pattern:$0x75316420] }
  0x28   : > { %871 = vst [vmem:[#allocation1] ss:$2 sm:$0xff] %v1859_v4 }
  0x2f   : > { %v872_v43 = vld.sshfl [vmem:[#allocation1 + $0x8] sm:$0xff pattern:$0x75316420] }
  0x30   : > { %1023 = vst [vmem:[#allocation1] ss:$2 sm:$0xff] %v1859_v4 }
  0x37   : > { %v1024_v45 = vld.sshfl [vmem:[#allocation1 + $0x8] sm:$0xff pattern:$0x75316420] }
  0x38   : > { %1177 = vst [vmem:[#allocation1] ss:$2 sm:$0xff] %v1859_v4 }
  0x3f   : > { %v1178_v47 = vld.sshfl [vmem:[#allocation1 + $0x8] sm:$0xff pattern:$0x75316420] }
  0x40   : > { %1331 = vst [vmem:[#allocation1] ss:$2 sm:$0xff] %v1859_v4 }
  0x47   : > { %v1332_v54 = vld.sshfl [vmem:[#allocation1 + $0x8] sm:$0xff pattern:$0x75316420] }
  0x8a   : > { %v412_v8 = vpop.permute.xlu0 %411 }
  0x91   : > { %v277_v7 = vpop.f32.mrf.mxu0 }
  0x92   : > { %340 = vrot.lane.b32.xlu0 %v277_v7, %s1776_s8  ;;  %1620 = vmatpush.msk.msra.mxu2 %vm290_vm1, %v277_v7 }
  0x93   : > { %1621 = vmatmul.msk.f32.vlgmr.msra.gmra.mxu2 %vm286_vm2, %v1870_v6 }
  0x94   : > { %427 = vmatpush.msrb.mxu2 %v1833_v0 }
  0x96   : > { %428 = vmatpush.msrb.mxu2 %v1838_v1 }
  0x98   : > { %429 = vmatpush.msrb.mxu2 %v1844_v2 }
  0x9a   : > { %284 = vrot.lane.b32.xlu0 %v277_v7, %s1777_s9  ;;  %430 = vmatpush.msrb.mxu2 %v1850_v3 }
  0x9b   : > { %1628 = vmatmul.msk.f32.vlgmr.msrb.gmra.mxu2 %vm256_vm0, %v412_v8 }
 0x104   : > { %v341_v11 = vpop.permute.xlu0 %340 }
 0x105   : > { %1623 = vmatpush.msk.msra.mxu3 %vm290_vm1, %v341_v11 }
 0x106   : > { %1624 = vmatmul.msk.f32.vlgmr.msra.gmra.mxu3 %vm286_vm2, %v1886_v10 }
 0x10c   : > { %v285_v13 = vpop.permute.xlu0 %284 }
 0x10d   : > { %1618 = vmatpush.msk.msra.mxu1 %vm290_vm1, %v285_v13 }
 0x10e   : > { %1619 = vmatmul.msk.f32.vlgmr.msra.gmra.mxu1 %vm286_vm2, %v1894_v12 }
 0x116   : > { %v335_v14 = vpop.f32.mrf.mxu2 }
 0x11e   : > { %v432_v15 = vpop.f32.mrf.mxu2 }
 0x11f   : > { %438 = vrot.lane.b32.xlu1 %v432_v15, %s1777_s9  ;;  %1632 = vmatpush.msk.msrb.mxu0 %vm290_vm1, %v432_v15 }
 0x120   : > { %1633 = vmatmul.msk.f32.vlgmr.msrb.gmra.mxu0 %vm286_vm2, %v1870_v6 }
 0x127   : > { %565 = vrot.lane.b32.xlu1 %v564_v9, %s1778_s14 }
 0x12f   : > { %370 = vrot.lane.b32.xlu1 %v277_v7, %s1779_s15 }
 0x137   : > { %520 = vrot.lane.b32.xlu1 %v432_v15, %s1779_s15 }
 0x13f   : > { %1025 = vrot.lane.b32.xlu1 %v1024_v45, %s1775_s5  ;;  %s1786_s5 = smov 56  }
 0x189   : > { %v364_v22 = vpop.f32.mrf.mxu3 }
 0x18b   : > { %v310_v24 = vpop.f32.mrf.mxu1 }
 0x18c   : > { %v336_v25 = vadd.f32 %v335_v14, %v310_v24 }
 0x18e   : > { %v367_v27 = vadd.f32 %v364_v22, %v336_v25 }
 0x191   : > { %v439_v16 = vpop.permute.xlu1 %438 }
 0x192   : > { %1630 = vmatpush.msk.msrb.mxu3 %vm290_vm1, %v439_v16 }
 0x193   : > { %1631 = vmatmul.msk.f32.vlgmr.msrb.gmra.mxu3 %vm286_vm2, %v1894_v12 }
 0x194   : > { %581 = vmatpush.msra.mxu3 %v1833_v0 }
 0x196   : > { %582 = vmatpush.msra.mxu3 %v1838_v1 }
 0x198   : > { %583 = vmatpush.msra.mxu3 %v1844_v2 }
 0x199   : > { %v566_v17 = vpop.permute.xlu1 %565 }
 0x19a   : > { %584 = vmatpush.msra.mxu3 %v1850_v3 }
 0x19b   : > { %1640 = vmatmul.msk.f32.vlgmr.msra.gmra.mxu3 %vm256_vm0, %v566_v17 }
 0x19d   : > { %v487_v35 = vpop.f32.mrf.mxu0 }
 0x1a1   : > { %v371_v19 = vpop.permute.xlu1 %370 }
 0x1a2   : > { %1626 = vmatpush.msk.msrb.mxu1 %vm290_vm1, %v371_v19 }
 0x1a3   : > { %1627 = vmatmul.msk.f32.vlgmr.msrb.gmra.mxu1 %vm286_vm2, %v1917_v18 }
 0x1a9   : > { %v521_v20 = vpop.permute.xlu1 %520 }
 0x1aa   : > { %1638 = vmatpush.msk.msra.mxu2 %vm290_vm1, %v521_v20 }
 0x1ab   : > { %1639 = vmatmul.msk.f32.vlgmr.msra.gmra.mxu2 %vm286_vm2, %v1917_v18 }
 0x1b1   : > { %v1026_v51 = vpop.permute.xlu1 %1025 }
 0x216   : > { %v462_v23 = vpop.f32.mrf.mxu3 }
 0x217   : > { %v488_v38 = vadd.f32 %v487_v35, %v462_v23 }
 0x21e   : > { %v586_v26 = vpop.f32.mrf.mxu3 }
 0x21f   : > { %592 = vrot.lane.b32.xlu2 %v586_v26, %s1777_s9 }
 0x220   : > { %v394_v28 = vpop.f32.mrf.mxu1 }
 0x221   : > { %v1933_v29 = vadd.f32 %v394_v28, %v367_v27 }
 0x223   : > { %399 = vst.msk [vmem:[%s1931_s23] sm:$0xff] %vm398_vm3, %v1933_v29  ;;  %v404_v23 = vmul.f32 %v1933_v29, %v1933_v29  ;;  %v400_v25 = vsel %vm398_vm3, %v1933_v29, 0.0 }
 0x225   : > { %v405_v24 = vsel %vm398_vm3, %v404_v23, 0.0 }
 0x227   : > { %719 = vrot.lane.b32.xlu2 %v718_v21, %s1780_s24 }
 0x22e   : > { %v544_v40 = vpop.f32.mrf.mxu2 }
 0x22f   : > { %491 = vrot.lane.b32.xlu2 %v432_v15, %s1776_s8 }
 0x237   : > { %645 = vrot.lane.b32.xlu2 %v586_v26, %s1776_s8 }
 0x23f   : > { %674 = vrot.lane.b32.xlu2 %v586_v26, %s1779_s15 }
 0x247   : > { %1179 = vrot.lane.b32.xlu2 %v1178_v47, %s1778_s14 }
 0x279   : > { %v593_v30 = vpop.permute.xlu2 %592 }
 0x27a   : > { %1642 = vmatpush.msk.msra.mxu0 %vm290_vm1, %v593_v30 }
 0x27b   : > { %1643 = vmatmul.msk.f32.vlgmr.msra.gmra.mxu0 %vm286_vm2, %v1894_v12 }
 0x27c   : > { %735 = vmatpush.msrb.mxu0 %v1833_v0 }
 0x27e   : > { %736 = vmatpush.msrb.mxu0 %v1838_v1 }
 0x280   : > { %737 = vmatpush.msrb.mxu0 %v1844_v2 }
 0x281   : > { %v720_v31 = vpop.permute.xlu2 %719 }
 0x282   : > { %738 = vmatpush.msrb.mxu0 %v1850_v3 }
 0x283   : > { %1652 = vmatmul.msk.f32.vlgmr.msrb.gmra.mxu0 %vm256_vm0, %v720_v31 }
 0x289   : > { %v492_v32 = vpop.permute.xlu2 %491 }
 0x28a   : > { %1635 = vmatpush.msk.msra.mxu1 %vm290_vm1, %v492_v32 }
 0x28b   : > { %1636 = vmatmul.msk.f32.vlgmr.msra.gmra.mxu1 %vm286_vm2, %v1886_v10 }
 0x28c   : > { %1644 = vmatpush.msk.msrb.mxu1 %vm290_vm1, %v586_v26 }
 0x291   : > { %v646_v33 = vpop.permute.xlu2 %645 }
 0x292   : > { %1647 = vmatpush.msk.msrb.mxu2 %vm290_vm1, %v646_v33 }
 0x293   : > { %1645 = vmatmul.msk.f32.vlgmr.msrb.gmra.mxu1 %vm286_vm2, %v1870_v6  ;;  %1648 = vmatmul.msk.f32.vlgmr.msrb.gmra.mxu2 %vm286_vm2, %v1886_v10 }
 0x299   : > { %v675_v34 = vpop.permute.xlu2 %674 }
 0x29a   : > { %1650 = vmatpush.msk.msrb.mxu3 %vm290_vm1, %v675_v34 }
 0x29b   : > { %1651 = vmatmul.msk.f32.vlgmr.msrb.gmra.mxu3 %vm286_vm2, %v1917_v18 }
 0x2a1   : > { %v1180_v4 = vpop.permute.xlu2 %1179 }
 0x2f8   : > { %v1962_v36 = vpop.f32.mrf.mxu0 }
 0x300   : > { %v740_v37 = vpop.f32.mrf.mxu0 }
 0x301   : > { %746 = vrot.lane.b32.xlu0 %v740_v37, %s1777_s9  ;;  %1656 = vmatpush.msk.msra.mxu2 %vm290_vm1, %v740_v37 }
 0x302   : > { %1657 = vmatmul.msk.f32.vlgmr.msra.gmra.mxu2 %vm286_vm2, %v1870_v6 }
 0x308   : > { %v515_v39 = vpop.f32.mrf.mxu1 }
 0x309   : > { %v518_v41 = vadd.f32 %v515_v39, %v488_v38 }
 0x30b   : > { %v1968_v42 = vadd.f32 %v544_v40, %v518_v41 }
 0x30d   : > { %v558_v27 = vmul.f32 %v1968_v42, %v1968_v42  ;;  %v554_v28 = vsel %vm398_vm3, %v1968_v42, 0.0 }
 0x30f   : > { %v559_v31 = vsel %vm398_vm3, %v558_v27, 0.0 }
 0x310   : > { %v1981_v46 = vpop.f32.mrf.mxu1 }
 0x311   : > { %v642_v26 = vadd.f32 %v1981_v46, %v1962_v36 }
 0x316   : > { %v2006_v55 = vpop.f32.mrf.mxu2 }
 0x31e   : > { %v2008_v57 = vpop.f32.mrf.mxu3 }
 0x373   : > { %v747_v44 = vpop.permute.xlu0 %746 }
 0x374   : > { %1654 = vmatpush.msk.msra.mxu1 %vm290_vm1, %v747_v44 }
 0x375   : > { %1655 = vmatmul.msk.f32.vlgmr.msra.gmra.mxu1 %vm286_vm2, %v1894_v12 }
 0x376   : > { %887 = vmatpush.msrb.mxu1 %v1833_v0 }
 0x378   : > { %888 = vmatpush.msrb.mxu1 %v1838_v1 }
 0x37a   : > { %889 = vmatpush.msrb.mxu1 %v1844_v2 }
 0x37c   : > { %890 = vmatpush.msrb.mxu1 %v1850_v3 }
 0x37d   : > { %1664 = vmatmul.msk.f32.vlgmr.msrb.gmra.mxu1 %vm256_vm0, %v872_v43 }
 0x385   : > { %v795_v56 = vpop.f32.mrf.mxu2 }
 0x3f2   : > { %v770_v48 = vpop.f32.mrf.mxu1 }
 0x3f3   : > { %v796_v59 = vadd.f32 %v795_v56, %v770_v48 }
 0x3fa   : > { %v892_v49 = vpop.f32.mrf.mxu1 }
 0x3fb   : > { %898 = vrot.lane.b32.xlu0 %v892_v49, %s1777_s9 }
 0x403   : > { %799 = vrot.lane.b32.xlu0 %v740_v37, %s1776_s8 }
 0x40b   : > { %828 = vrot.lane.b32.xlu0 %v740_v37, %s1779_s15 }
 0x413   : > { %1333 = vrot.lane.b32.xlu0 %v1332_v54, %s1780_s24 }
 0x46d   : > { %v899_v50 = vpop.permute.xlu0 %898 }
 0x46e   : > { %1666 = vmatpush.msk.msrb.mxu2 %vm290_vm1, %v899_v50 }
 0x46f   : > { %1667 = vmatmul.msk.f32.vlgmr.msrb.gmra.mxu2 %vm286_vm2, %v1894_v12 }
 0x470   : > { %1041 = vmatpush.msra.mxu2 %v1833_v0 }
 0x472   : > { %1042 = vmatpush.msra.mxu2 %v1838_v1 }
 0x474   : > { %1043 = vmatpush.msra.mxu2 %v1844_v2 }
 0x475   : > { %v800_v52 = vpop.permute.xlu0 %799 }
 0x476   : > { %1659 = vmatpush.msk.msra.mxu3 %vm290_vm1, %v800_v52  ;;  %1044 = vmatpush.msra.mxu2 %v1850_v3 }
 0x477   : > { %1660 = vmatmul.msk.f32.vlgmr.msra.gmra.mxu3 %vm286_vm2, %v1886_v10  ;;  %1676 = vmatmul.msk.f32.vlgmr.msra.gmra.mxu2 %vm256_vm0, %v1026_v51 }
 0x478   : > { %1668 = vmatpush.msk.msrb.mxu3 %vm290_vm1, %v892_v49 }
 0x47d   : > { %v829_v53 = vpop.permute.xlu0 %828 }
 0x47e   : > { %1662 = vmatpush.msk.msra.mxu0 %vm290_vm1, %v829_v53 }
 0x47f   : > { %1663 = vmatmul.msk.f32.vlgmr.msra.gmra.mxu0 %vm286_vm2, %v1917_v18  ;;  %1669 = vmatmul.msk.f32.vlgmr.msrb.gmra.mxu3 %vm286_vm2, %v1870_v6 }
 0x485   : > { %v1334_v5 = vpop.permute.xlu0 %1333 }
 0x4f2   : > { %v922_v58 = vpop.f32.mrf.mxu2 }
 0x4fa   : > { %v823_v60 = vpop.f32.mrf.mxu3  ;;  %v1046_v61 = vpop.f32.mrf.mxu2 }
 0x4fb   : > { %v2010_v62 = vadd.f32 %v823_v60, %v796_v59  ;;  %1105 = vrot.lane.b32.xlu0 %v1046_v61, %s1776_s8  ;;  %1052 = vrot.lane.b32.xlu1 %v1046_v61, %s1777_s9 }
 0x4fc   : > { %v852_v13 = vpop.f32.mrf.mxu0 }
 0x4fd   : > { %v855_v34 = vadd.f32 %v852_v13, %v2010_v62 }
 0x4ff   : > { %v862_v35 = vsel %vm398_vm3, %v855_v34, 0.0  ;;  %v866_v37 = vmul.f32 %v855_v34, %v855_v34 }
 0x501   : > { %v867_v39 = vsel %vm398_vm3, %v866_v37, 0.0 }
 0x502   : > { %v947_v11 = vpop.f32.mrf.mxu3 }
 0x503   : > { %951 = vrot.lane.b32.xlu1 %v892_v49, %s1776_s8  ;;  %v948_v15 = vadd.f32 %v947_v11, %v922_v58 }
 0x50b   : > { %980 = vrot.lane.b32.xlu1 %v892_v49, %s1779_s15 }
 0x56d   : > { %v1053_v63 = vpop.permute.xlu1 %1052  ;;  %v1106_v9 = vpop.permute.xlu0 %1105 }
 0x56e   : > { %1678 = vmatpush.msk.msra.mxu3 %vm290_vm1, %v1053_v63 }
 0x56f   : > { %1679 = vmatmul.msk.f32.vlgmr.msra.gmra.mxu3 %vm286_vm2, %v1894_v12 }
 0x570   : > { %1195 = vmatpush.msrb.mxu3 %v1833_v0 }
 0x572   : > { %1196 = vmatpush.msrb.mxu3 %v1838_v1 }
 0x574   : > { %1197 = vmatpush.msrb.mxu3 %v1844_v2 }
 0x575   : > { %v952_v7 = vpop.permute.xlu1 %951 }
 0x576   : > { %1671 = vmatpush.msk.msrb.mxu0 %vm290_vm1, %v952_v7  ;;  %1198 = vmatpush.msrb.mxu3 %v1850_v3 }
 0x577   : > { %1672 = vmatmul.msk.f32.vlgmr.msrb.gmra.mxu0 %vm286_vm2, %v1886_v10  ;;  %1688 = vmatmul.msk.f32.vlgmr.msrb.gmra.mxu3 %vm256_vm0, %v1180_v4 }
 0x578   : > { %1680 = vmatpush.msk.msra.mxu0 %vm290_vm1, %v1046_v61 }
 0x57d   : > { %v981_v8 = vpop.permute.xlu1 %980 }
 0x57e   : > { %1674 = vmatpush.msk.msra.mxu1 %vm290_vm1, %v981_v8 }
 0x57f   : > { %1675 = vmatmul.msk.f32.vlgmr.msra.gmra.mxu1 %vm286_vm2, %v1917_v18  ;;  %1681 = vmatmul.msk.f32.vlgmr.msra.gmra.mxu0 %vm286_vm2, %v1870_v6 }
 0x580   : > { %1683 = vmatpush.msk.msrb.mxu1 %vm290_vm1, %v1106_v9 }
 0x587   : > { %1684 = vmatmul.msk.f32.vlgmr.msrb.gmra.mxu1 %vm286_vm2, %v1886_v10 }
 0x5f2   : > { %v2036_v14 = vpop.f32.mrf.mxu3 }
 0x5f4   : > { %v975_v16 = vpop.f32.mrf.mxu0 }
 0x5f5   : > { %v978_v17 = vadd.f32 %v975_v16, %v948_v15 }
 0x5fa   : > { %v1200_v19 = vpop.f32.mrf.mxu3 }
 0x5fb   : > { %1259 = vrot.lane.b32.xlu1 %v1200_v19, %s1776_s8  ;;  %1206 = vrot.lane.b32.xlu2 %v1200_v19, %s1777_s9 }
 0x5fc   : > { %1692 = vmatpush.msk.msra.mxu1 %vm290_vm1, %v1200_v19  ;;  %v1004_v36 = vpop.f32.mrf.mxu1 }
 0x5fd   : > { %1693 = vmatmul.msk.f32.vlgmr.msra.gmra.mxu1 %vm286_vm2, %v1870_v6  ;;  %v1007_v38 = vadd.f32 %v1004_v36, %v978_v17 }
 0x603   : > { %1134 = vrot.lane.b32.xlu2 %v1046_v61, %s1779_s15 }
 0x604   : > { %v1129_v40 = vpop.f32.mrf.mxu1 }
 0x60b   : > { %1288 = vrot.lane.b32.xlu2 %v1200_v19, %s1779_s15 }
 0x655   : > { %v1207_v20 = vpop.permute.xlu2 %1206 }
 0x656   : > { %1690 = vmatpush.msk.msrb.mxu0 %vm290_vm1, %v1207_v20 }
 0x657   : > { %1691 = vmatmul.msk.f32.vlgmr.msrb.gmra.mxu0 %vm286_vm2, %v1894_v12 }
 0x658   : > { %1349 = vmatpush.msra.mxu0 %v1833_v0 }
 0x65a   : > { %1350 = vmatpush.msra.mxu0 %v1838_v1  ;;  %v1101_v1 = vpop.f32.mrf.mxu0 }
 0x65b   : > { %v1102_v41 = vadd.f32 %v1101_v1, %v2036_v14 }
 0x65c   : > { %1351 = vmatpush.msra.mxu0 %v1844_v2 }
 0x65d   : > { %v1135_v21 = vpop.permute.xlu2 %1134  ;;  %v1132_v44 = vadd.f32 %v1129_v40, %v1102_v41 }
 0x65e   : > { %1686 = vmatpush.msk.msrb.mxu2 %vm290_vm1, %v1135_v21  ;;  %1352 = vmatpush.msra.mxu0 %v1850_v3 }
 0x65f   : > { %1687 = vmatmul.msk.f32.vlgmr.msrb.gmra.mxu2 %vm286_vm2, %v1917_v18  ;;  %1700 = vmatmul.msk.f32.vlgmr.msra.gmra.mxu0 %vm256_vm0, %v1334_v5 }
 0x665   : > { %v1289_v22 = vpop.permute.xlu2 %1288 }
 0x666   : > { %1698 = vmatpush.msk.msra.mxu3 %vm290_vm1, %v1289_v22 }
 0x667   : > { %1699 = vmatmul.msk.f32.vlgmr.msra.gmra.mxu3 %vm286_vm2, %v1917_v18 }
 0x66d   : > { %v1260_v0 = vpop.permute.xlu1 %1259 }
 0x66e   : > { %1695 = vmatpush.msk.msra.mxu2 %vm290_vm1, %v1260_v0 }
 0x66f   : > { %1696 = vmatmul.msk.f32.vlgmr.msra.gmra.mxu2 %vm286_vm2, %v1886_v10 }
 0x67a   : > { %v1255_v49 = vpop.f32.mrf.mxu1 }
 0x6d4   : > { %v1230_v2 = vpop.f32.mrf.mxu0 }
 0x6d5   : > { %v1256_v51 = vadd.f32 %v1255_v49, %v1230_v2 }
 0x6dc   : > { %v1354_v3 = vpop.f32.mrf.mxu0 }
 0x6dd   : > { %1442 = vrot.lane.b32.xlu2 %v1354_v3, %s1779_s15  ;;  %1360 = vrot.lane.b32.xlu1 %v1354_v3, %s1777_s9 }
 0x6de   : > { %1413 = vrot.lane.b32.xlu0 %v1354_v3, %s1776_s8  ;;  %1704 = vmatpush.msk.msrb.mxu2 %vm290_vm1, %v1354_v3  ;;  %s250_s8 = scalar_lea.vmem %s2131_s4, %s1852_s27 }
 0x6df   : > { %1705 = vmatmul.msk.f32.vlgmr.msrb.gmra.mxu2 %vm286_vm2, %v1870_v6  ;;  %v672_v6 = vadd.f32 %v2006_v55, %v642_v26  ;;  %v1018_v55 = vmul.f32 %v1007_v38, %v1007_v38 }
 0x6e1   : > { %v701_v30 = vadd.f32 %v2008_v57, %v672_v6 }
 0x6e2   : > { %v1158_v43 = vpop.f32.mrf.mxu2 }
 0x6e3   : > { %v712_v32 = vmul.f32 %v701_v30, %v701_v30  ;;  %v708_v29 = vsel %vm398_vm3, %v701_v30, 0.0  ;;  %v1161_v45 = vadd.f32 %v1158_v43, %v1132_v44 }
 0x6e5   : > { %549 = vrot.lane.b32.xlu2 %v1968_v42, %s1781_s25  ;;  %v713_v33 = vsel %vm398_vm3, %v712_v32, 0.0  ;;  %v1014_v42 = vsel %vm398_vm3, %v1007_v38, 0.0  ;;  %v1168_v47 = vsel %vm398_vm3, %v1161_v45, 0.0  ;;  %v1172_v60 = vmul.f32 %v1161_v45, %v1161_v45 }
 0x6e7   : > { %v1173_v61 = vsel %vm398_vm3, %v1172_v60, 0.0 }
 0x6ea   : > { %v1312_v53 = vpop.f32.mrf.mxu3 }
 0x6f2   : > { %v1283_v50 = vpop.f32.mrf.mxu2 }
 0x6f3   : > { %v1286_v52 = vadd.f32 %v1283_v50, %v1256_v51 }
 0x6f5   : > { %v1315_v54 = vadd.f32 %v1312_v53, %v1286_v52 }
 0x6f7   : > { %v1326_v58 = vmul.f32 %v1315_v54, %v1315_v54  ;;  %v1322_v62 = vsel %vm398_vm3, %v1315_v54, 0.0 }
 0x6f9   : > { %v1327_v59 = vsel %vm398_vm3, %v1326_v58, 0.0 }
 0x707   : > { %406 = vadd.xlane.f32.xlu1 %v405_v24 }
 0x708   : > { %401 = vadd.xlane.f32.xlu0 %v400_v25 }
 0x70e   : > { %555 = vadd.xlane.f32.xlu2 %v554_v28 }
 0x710   : > { %560 = vadd.xlane.f32.xlu0 %v559_v31 }
 0x716   : > { %709 = vadd.xlane.f32.xlu2 %v708_v29 }
 0x718   : > { %714 = vadd.xlane.f32.xlu0 %v713_v33 }
 0x720   : > { %863 = vadd.xlane.f32.xlu0 %v862_v35  ;;  %703 = vrot.lane.b32.xlu1 %v701_v30, %s1782_s26 }
 0x728   : > { %868 = vadd.xlane.f32.xlu0 %v867_v39  ;;  %1009 = vrot.lane.b32.xlu1 %v1007_v38, %s1780_s24 }
 0x72e   : > { %857 = vrot.lane.b32.xlu2 %v855_v34, %s1783_s28 }
 0x730   : > { %1015 = vadd.xlane.f32.xlu0 %v1014_v42 }
 0x736   : > { %1163 = vrot.lane.b32.xlu2 %v1161_v45, %s1784_s29 }
 0x737   : > { %v1443_v46 = vpop.permute.xlu2 %1442 }
 0x738   : > { %1169 = vadd.xlane.f32.xlu0 %v1168_v47  ;;  %1710 = vmatpush.msk.msrb.mxu0 %vm290_vm1, %v1443_v46 }
 0x739   : > { %1711 = vmatmul.msk.f32.vlgmr.msrb.gmra.mxu0 %vm286_vm2, %v1917_v18  ;;  %v1019_v18 = vsel %vm398_vm3, %v1018_v55, 0.0 }
 0x73f   : > { %v550_v48 = vpop.permute.xlu2 %549 }
 0x740   : > { %553 = vst.msk [vmem:[%s1931_s23] sm:$0xff] %vm552_vm4, %v550_v48 }
 0x74c   : > { %1317 = vrot.lane.b32.xlu0 %v1315_v54, %s1785_s30 }
 0x74f   : > { %v1361_v56 = vpop.permute.xlu1 %1360 }
 0x750   : > { %v1414_v57 = vpop.permute.xlu0 %1413  ;;  %1702 = vmatpush.msk.msrb.mxu1 %vm290_vm1, %v1361_v56 }
 0x751   : > { %1707 = vmatpush.msk.msrb.mxu3 %vm290_vm1, %v1414_v57  ;;  %1703 = vmatmul.msk.f32.vlgmr.msrb.gmra.mxu1 %vm286_vm2, %v1894_v12 }
 0x752   : > { %1708 = vmatmul.msk.f32.vlgmr.msrb.gmra.mxu3 %vm286_vm2, %v1886_v10  ;;  %1020 = vadd.xlane.f32.xlu1 %v1019_v18 }
 0x75a   : > { %1328 = vadd.xlane.f32.xlu1 %v1327_v59 }
 0x75f   : > { %1174 = vadd.xlane.f32.xlu2 %v1173_v61 }
 0x762   : > { %v1409_v25 = vpop.f32.mrf.mxu2 }
 0x776   : > { %1323 = vadd.xlane.f32.xlu0 %v1322_v62 }
 0x77a   : > { %v407_v5 = vpop.xlane.xlu1 %406 }
 0x77b   : > { %v402_v63 = vpop.xlane.xlu0 %401 }
 0x781   : > { %v556_v4 = vpop.xlane.xlu2 %555 }
 0x782   : > { %v557_v12 = vadd.f32 %v556_v4, %v402_v63 }
 0x783   : > { %v561_v7 = vpop.xlane.xlu0 %560 }
 0x784   : > { %v562_v10 = vadd.f32 %v561_v7, %v407_v5 }
 0x789   : > { %v710_v8 = vpop.xlane.xlu2 %709 }
 0x78a   : > { %v711_v9 = vadd.f32 %v710_v8, %v557_v12 }
 0x78b   : > { %v715_v11 = vpop.xlane.xlu0 %714 }
 0x78c   : > { %v716_v13 = vadd.f32 %v715_v11, %v562_v10 }
 0x791   : > { %v858_v14 = vpop.permute.xlu2 %857 }
 0x792   : > { %v704_v15 = vpop.permute.xlu1 %703 }
 0x793   : > { %707 = vst.msk [vmem:[%s1931_s23] sm:$0xff] %vm706_vm5, %v704_v15  ;;  %v864_v16 = vpop.xlane.xlu0 %863 }
 0x794   : > { %v865_v17 = vadd.f32 %v864_v16, %v711_v9  ;;  %861 = vst.msk [vmem:[%s1931_s23] sm:$0xff] %vm860_vm6, %v858_v14 }
 0x799   : > { %v1164_v20 = vpop.permute.xlu2 %1163 }
 0x79a   : > { %v1010_v19 = vpop.permute.xlu1 %1009 }
 0x79b   : > { %1013 = vst.msk [vmem:[%s1931_s23] sm:$0xff] %vm1012_vm7, %v1010_v19  ;;  %v869_v21 = vpop.xlane.xlu0 %868 }
 0x79c   : > { %v870_v22 = vadd.f32 %v869_v21, %v716_v13  ;;  %1167 = vst.msk [vmem:[%s1931_s23] sm:$0xff] %vm1166_vm8, %v1164_v20 }
 0x7a3   : > { %v1016_v0 = vpop.xlane.xlu0 %1015 }
 0x7a4   : > { %v1017_v1 = vadd.f32 %v1016_v0, %v865_v17 }
 0x7ab   : > { %v1170_v2 = vpop.xlane.xlu0 %1169 }
 0x7ac   : > { %v1171_v3 = vadd.f32 %v1170_v2, %v1017_v1 }
 0x7b6   : > { %v1466_v6 = vpop.f32.mrf.mxu0 }
 0x7be   : > { %v1318_v23 = vpop.permute.xlu0 %1317 }
 0x7bf   : > { %1321 = vst.msk [vmem:[%s1931_s23] sm:$0xff] %vm1320_vm9, %v1318_v23 }
 0x7c5   : > { %v1021_v33 = vpop.xlane.xlu1 %1020 }
 0x7c6   : > { %v1022_v36 = vadd.f32 %v1021_v33, %v870_v22 }
 0x7cd   : > { %v1329_v34 = vpop.xlane.xlu1 %1328 }
 0x7ce   : > { %v1384_v24 = vpop.f32.mrf.mxu1 }
 0x7cf   : > { %v1410_v26 = vadd.f32 %v1409_v25, %v1384_v24 }
 0x7d2   : > { %v1175_v35 = vpop.xlane.xlu2 %1174 }
 0x7d3   : > { %v1176_v38 = vadd.f32 %v1175_v35, %v1022_v36 }
 0x7d5   : > { %v1437_v27 = vpop.f32.mrf.mxu3  ;;  %v1330_v42 = vadd.f32 %v1329_v34, %v1176_v38 }
 0x7d6   : > { %v1440_v28 = vadd.f32 %v1437_v27, %v1410_v26 }
 0x7d8   : > { %v1469_v30 = vadd.f32 %v1466_v6, %v1440_v28 }
 0x7da   : > { %v1476_v31 = vsel %vm398_vm3, %v1469_v30, 0.0  ;;  %v1480_v32 = vmul.f32 %v1469_v30, %v1469_v30 }
 0x7db   : > { %1477 = vadd.xlane.f32.xlu1 %v1476_v31 }
 0x7dc   : > { %v1481_v29 = vsel %vm398_vm3, %v1480_v32, 0.0 }
 0x7dd   : > { %1482 = vadd.xlane.f32.xlu2 %v1481_v29 }
 0x7e9   : > { %v1324_v37 = vpop.xlane.xlu0 %1323 }
 0x7ea   : > { %v1325_v39 = vadd.f32 %v1324_v37, %v1171_v3 }
 0x7f4   : > { %1471 = vrot.lane.b32.xlu1 %v1469_v30, %s1786_s5 }
 0x84e   : > { %v1478_v40 = vpop.xlane.xlu1 %1477 }
 0x84f   : > { %v1479_v41 = vadd.f32 %v1478_v40, %v1325_v39 }
 0x850   : > { %v1483_v43 = vpop.xlane.xlu2 %1482 }
 0x851   : > { %1486 = vst.msk [vmem:[%s250_s8] sm:$0xff] %vm1485_vm10, %v1479_v41  ;;  %v1484_v44 = vadd.f32 %v1483_v43, %v1330_v42 }
 0x853   : > { %1488 = vst.msk [vmem:[%s250_s8] sm:$0xff] %vm1487_vm11, %v1484_v44 }
 0x866   : > { %v1472_v45 = vpop.permute.xlu1 %1471 }
 0x867   : > { %1475 = vst.msk [vmem:[%s1931_s23] sm:$0xff] %vm1474_vm12, %v1472_v45 }
 0x868 PF: > { %s15_s17 = sadd.s32 1, %s1773_s17   ;;  %s2132_s15 = smov %s1769_s16 }
 0x869   : > { %p12_p5 = scmp.ge.s32.totalorder %s15_s17, 4   ;;  %s2133_s16 = smov %s2135_s18 }
 0x86b   :  { %14 = sbr.rel (!%p12_p5) target bundleno = 2 (0x2), region = 77 }

</bundles_post_ra>
